<compile_context>
chip_gen: v5e
topology: v5e:2x2
jax: 0.10.0
libtpu: 0.0.40
codegen_flags: <defaults>
</compile_context>

<pallas_src>
import functools
import math

import jax
import jax.numpy as jnp
from jax.experimental import pallas as pl
from jax.experimental.pallas import tpu as pltpu

_BLOCK_DIMS = [(1, 32), (32, 64), (64, 128), (128, 64)]   # (Cin, Cout) per conv block
_CP = 128                                                  # padded channel (lane) width
_BN_EPS = 1e-5


# ------------------------------ fused kernel ---------------------------------
def _fused_kernel(x_ref, w1_ref, wconv_ref, scale_ref, bias_ref, wf_ref,
                  o_ref, act, *, batch, length):
    """One branch of MultiCNN: 4 conv blocks + masked mean + per-branch fc slice.

    x_ref:     (1, B*L, 1)      f32   raw signal (length on sublanes)
    w1_ref:    (1, 3, 128)      f32   block-1 conv taps, lane-padded (VPU path)
    wconv_ref: (1, 3, 384, 128) bf16  compact im2col weights for blocks 2-4
                                      (block i uses only the first ceil(3*Cin/128)*128 rows)
    scale_ref: (1, 4, 128)      f32   folded BN scale per block (0 in padded lanes)
    bias_ref:  (1, 4, 128)      f32   conv-bias + BN shift per block (0 in padded lanes)
    wf_ref:    (1, 128, 128)    f32   this branch's slice of Linear(128->3), lane-padded
    o_ref:     (1, B, 128)      f32   partial logits in lanes 0..2 (summed over branches outside)
    act:       (B*L, 128)       f32   VMEM scratch holding the current activation
    """
    B, L = batch, length
    BL = B * L
    CP = act.shape[-1]
    Lf = L - 4                                   # valid length after the 4 blocks

    # Local (within-sample) position of every row of the (B*L, CP) slab.
    row = jax.lax.broadcasted_iota(jnp.int32, (BL, 1), 0)
    if L & (L - 1) == 0:
        lpos = jnp.bitwise_and(row, L - 1)
    else:
        lpos = row % L

    scales = scale_ref[0]                        # (4, CP)
    biases = bias_ref[0]                         # (4, CP)

    def epilogue(y, i, valid):
        # y: (B*L, CP) f32 conv output of block i (all batches stacked on sublanes).
        y = y * scales[i:i + 1, :] + biases[i:i + 1, :]    # Conv bias + BN (eval fold)
        y = jnp.where(y >= 0, y, 0.01 * y)                 # LeakyReLU(0.01)
        # MaxPool1d(2, stride=1): y[l+1] via a sublane roll (XLU) -- no store->load
        # round trip.  The rows it contaminates (each sample's local row L-1 picks up
        # the next sample's row 0) are masked below since valid <= L-1 always.
        y_next = pltpu.roll(y, shift=BL - 1, axis=0)       # == roll by -1
        pooled = jnp.maximum(y, y_next)
        pooled = jnp.where(lpos < valid, pooled, 0.0)      # zero the invalid tail rows
        act[...] = pooled                                   # single full aligned store

    # ---- block 1: Conv1d(1->32); K=1 input channel -> VPU multiply-adds ----
    xc = jnp.broadcast_to(x_ref[0], (BL, CP))              # (B*L, CP) lane broadcast
    # 'same' padding: x[l-1] / x[l+1] via sublane rolls; the raw signal is nonzero at
    # sample boundaries, so mask the wrapped boundary rows explicitly.
    xm = jnp.where(lpos > 0, pltpu.roll(xc, shift=1, axis=0), 0.0)
    xp = jnp.where(lpos < L - 1, pltpu.roll(xc, shift=BL - 1, axis=0), 0.0)
    w1 = w1_ref[0]                                         # (3, CP)
    y = xm * w1[0:1, :] + xc * w1[1:2, :] + xp * w1[2:3, :]
    epilogue(y, 0, L - 1)

    # ---- blocks 2-4: one batched (B*L, K) x (K, CP) bf16 MXU matmul per block ----
    # The previous block's output is exactly zero at each sample's rows >= valid, so
    # the sublane rolls need no boundary masks here:
    #   * xm row 0 picks up the previous sample's (zero) tail row,
    #   * xp row L-1 is contaminated but only feeds conv row L-1, which is never used
    #     (pooling only consumes y rows < valid_in = L - i).
    for i in range(1, 4):
        cin = _BLOCK_DIMS[i][0]
        k = ((3 * cin + CP - 1) // CP) * CP                # compact K: 128 / 256 / 384
        xc = act[...]                                      # aligned (B*L, CP) load
        xm = pltpu.roll(xc, shift=1, axis=0)               # x[l-1]
        xp = pltpu.roll(xc, shift=BL - 1, axis=0)          # x[l+1]
        if cin == 32:
            # lanes 0..31 = xm, 32..63 = xc, 64..95 = xp, 96..127 = 0 (weight rows too)
            x_cat = (xm + pltpu.roll(xc, shift=32, axis=1)
                     + pltpu.roll(xp, shift=64, axis=1))
        elif cin == 64:
            # slab0: lanes 0..63 = xm, 64..127 = xc ; slab1: lanes 0..63 = xp, rest 0
            x_cat = jnp.concatenate(
                [xm + pltpu.roll(xc, shift=64, axis=1), xp], axis=1)
        else:
            x_cat = jnp.concatenate([xm, xc, xp], axis=1)  # 128-lane-aligned concat
        w = wconv_ref[0, i - 1, :k, :]                     # (K, CP) bf16
        y = jnp.dot(x_cat.astype(jnp.bfloat16), w,
                    preferred_element_type=jnp.float32)    # (B*L, CP) f32
        epilogue(y, i, L - 1 - i)

    # ---- head: masked mean over length, this branch's half of Linear(128->3) ----
    # Invalid tail rows are exactly zero, so a plain sum / Lf equals the masked mean.
    feat = jnp.concatenate(
        [jnp.sum(act[b * L:(b + 1) * L, :], axis=0, keepdims=True) for b in range(B)],
        axis=0) * (1.0 / Lf)                               # (B, CP)
    o_ref[0] = jnp.dot(feat, wf_ref[0], preferred_element_type=jnp.float32)


# ------------------------------ params ---------------------------------------
def make_params(key):
    """Random parameters packed/padded for the fused kernel (2 branches stacked)."""
    key, kfc_w, kfc_b = jax.random.split(key, 3)
    fc_w = jax.random.normal(kfc_w, (3, 2 * 64), jnp.float32) / math.sqrt(128.0)
    fc_b = jax.random.normal(kfc_b, (3,), jnp.float32) * 0.05
    bn_scale = 1.0 / math.sqrt(1.0 + _BN_EPS)     # gamma / sqrt(var + eps), fresh BN

    w1_l, wconv_l, scale_l, bias_l, wf_l = [], [], [], [], []
    for branch in range(2):
        scales = jnp.zeros((4, _CP), jnp.float32)
        biases = jnp.zeros((4, _CP), jnp.float32)
        wconv = jnp.zeros((3, 3 * _CP, _CP), jnp.float32)
        w1 = jnp.zeros((3, _CP), jnp.float32)
        for i, (cin, cout) in enumerate(_BLOCK_DIMS):
            key, kw, kb = jax.random.split(key, 3)
            # Conv taps stored as (K=3, Cin, Cout); tap 0 multiplies x[l-1], tap 2 x[l+1].
            w = jax.random.normal(kw, (3, cin, cout), jnp.float32) / math.sqrt(3 * cin)
            conv_b = jax.random.normal(kb, (cout,), jnp.float32) * 0.05
            scales = scales.at[i, :cout].set(bn_scale)
            biases = biases.at[i, :cout].set(conv_b * bn_scale)  # + beta - mean*scale (=0)
            if i == 0:
                w1 = w1.at[:, :cout].set(w[:, 0, :])
            else:
                # Compact im2col packing: K rows [t*cin, (t+1)*cin) hold tap t; rows up
                # to the padded K stay zero (matches the in-kernel x_cat lane layout).
                for t in range(3):
                    wconv = wconv.at[i - 1, t * cin:(t + 1) * cin, :cout].set(w[t])
        # This branch's slice of Linear(128->3): acoustic -> fc cols :64, photodiode 64:.
        # Padded lane-dense to (128, 128); real logits live in output lanes 0..2.
        wf = jnp.zeros((_CP, _CP), jnp.float32).at[:64, :3].set(
            fc_w[:, branch * 64:(branch + 1) * 64].T)
        w1_l.append(w1); wconv_l.append(wconv)
        scale_l.append(scales); bias_l.append(biases); wf_l.append(wf)

    return {
        "w1": jnp.stack(w1_l),                                 # (2, 3, 128) f32
        "wconv": jnp.stack(wconv_l).astype(jnp.bfloat16),      # (2, 3, 384, 128) bf16
        "scales": jnp.stack(scale_l),                          # (2, 4, 128) f32
        "biases": jnp.stack(bias_l),                           # (2, 4, 128) f32
        "wf": jnp.stack(wf_l),                                 # (2, 128, 128) f32
        "fc_b": fc_b,                                          # (3,)
    }


# ------------------------------ forward ---------------------------------------
def multicnn_forward(params, x_acoustic, x_photodiode):
    """x_*: PyTorch-layout (B, 1, L) float32. Returns logits (B, 3)."""
    B = x_acoustic.shape[0]
    L = x_acoustic.shape[-1]
    xa = x_acoustic.reshape(B * L, 1).astype(jnp.float32)
    xph = x_photodiode.reshape(B * L, 1).astype(jnp.float32)
    x = jnp.stack([xa, xph], axis=0)                           # (2, B*L, 1)

    kernel = functools.partial(_fused_kernel, batch=B, length=L)
    partial_logits = pl.pallas_call(
        kernel,
        out_shape=jax.ShapeDtypeStruct((2, B, _CP), jnp.float32),
        grid=(2,),
        in_specs=[
            pl.BlockSpec((1, B * L, 1), lambda br: (br, 0, 0)),
            pl.BlockSpec((1, 3, _CP), lambda br: (br, 0, 0)),
            pl.BlockSpec((1, 3, 3 * _CP, _CP), lambda br: (br, 0, 0, 0)),
            pl.BlockSpec((1, 4, _CP), lambda br: (br, 0, 0)),
            pl.BlockSpec((1, 4, _CP), lambda br: (br, 0, 0)),
            pl.BlockSpec((1, _CP, _CP), lambda br: (br, 0, 0)),
        ],
        out_specs=pl.BlockSpec((1, B, _CP), lambda br: (br, 0, 0)),
        scratch_shapes=[pltpu.VMEM((B * L, _CP), jnp.float32)],
        compiler_params=pltpu.CompilerParams(
            dimension_semantics=("parallel",)),
    )(x, params["w1"], params["wconv"], params["scales"], params["biases"],
      params["wf"])

    # concat(acoustic, photodiode) @ W + b  ==  sum of per-branch partial projections + b.
    # Kept outside the kernel so the branch grid axis stays "parallel" (safe on v7x's
    # two TensorCores); on single-TC v5e/v6e this is one trivial XLA add.
    out = partial_logits[0] + partial_logits[1]
    return out[:, :3] + params["fc_b"]


if __name__ == "__main__":
    key = jax.random.PRNGKey(0)
    kp, ka, kph = jax.random.split(key, 3)

    params = make_params(kp)

    B, L = 2, 64
    x_acoustic = jax.random.normal(ka, (B, 1, L), jnp.float32)     # NCW, like PyTorch
    x_photodiode = jax.random.normal(kph, (B, 1, L), jnp.float32)

    logits = multicnn_forward(params, x_acoustic, x_photodiode)
    logits = jax.block_until_ready(logits)

    assert logits.shape == (B, 3), logits.shape
    assert bool(jnp.all(jnp.isfinite(logits)))
    print("KERNEL_OK")
</pallas_src>

<mosaic_0001>
module attributes {stable_mosaic.version = 11 : i64} {
  func.func @_fused_kernel(%arg0: i32, %arg1: memref<1x128x1xf32, #tpu.memory_space<vmem>>, %arg2: memref<1x3x128xf32, #tpu.memory_space<vmem>>, %arg3: memref<1x3x384x128xbf16, #tpu.memory_space<vmem>>, %arg4: memref<1x4x128xf32, #tpu.memory_space<vmem>>, %arg5: memref<1x4x128xf32, #tpu.memory_space<vmem>>, %arg6: memref<1x128x128xf32, #tpu.memory_space<vmem>>, %arg7: memref<1x2x128xf32, #tpu.memory_space<vmem>>, %arg8: memref<128x128xf32, #tpu.memory_space<vmem>>) attributes {dimension_semantics = [#tpu.dimension_semantics<parallel>], iteration_bounds = array<i64: 2>, scalar_prefetch = 0 : i64, scratch_operands = 1 : i64, tpu.core_type = #tpu.core_type<tc>, window_params = [{transform_indices = @transform_0, window_bounds = array<i64: 1, 128, 1>}, {transform_indices = @transform_1, window_bounds = array<i64: 1, 3, 128>}, {transform_indices = @transform_2, window_bounds = array<i64: 1, 3, 384, 128>}, {transform_indices = @transform_3, window_bounds = array<i64: 1, 4, 128>}, {transform_indices = @transform_4, window_bounds = array<i64: 1, 4, 128>}, {transform_indices = @transform_5, window_bounds = array<i64: 1, 128, 128>}, {transform_indices = @transform_6, window_bounds = array<i64: 1, 2, 128>}]} {
    %0 = tpu.iota {dimensions = array<i32: 0>} : vector<128x1xi32>
    %c63_i32 = arith.constant 63 : i32
    %1 = vector.broadcast %c63_i32 : i32 to vector<128x1xi32>
    %2 = arith.andi %0, %1 : vector<128x1xi32>
    %c0 = arith.constant 0 : index
    %c0_0 = arith.constant 0 : index
    %c0_1 = arith.constant 0 : index
    %3 = vector.load %arg4[%c0, %c0_0, %c0_1] : memref<1x4x128xf32, #tpu.memory_space<vmem>>, vector<1x4x128xf32>
    %4 = vector.shape_cast %3 : vector<1x4x128xf32> to vector<4x128xf32>
    %c0_2 = arith.constant 0 : index
    %c0_3 = arith.constant 0 : index
    %c0_4 = arith.constant 0 : index
    %5 = vector.load %arg5[%c0_2, %c0_3, %c0_4] : memref<1x4x128xf32, #tpu.memory_space<vmem>>, vector<1x4x128xf32>
    %6 = vector.shape_cast %5 : vector<1x4x128xf32> to vector<4x128xf32>
    %c0_5 = arith.constant 0 : index
    %c0_6 = arith.constant 0 : index
    %c0_7 = arith.constant 0 : index
    %7 = vector.load %arg1[%c0_5, %c0_6, %c0_7] : memref<1x128x1xf32, #tpu.memory_space<vmem>>, vector<1x128x1xf32>
    %8 = vector.shape_cast %7 : vector<1x128x1xf32> to vector<128x1xf32>
    %9 = vector.shape_cast %8 : vector<128x1xf32> to vector<128x1xf32>
    %10 = vector.broadcast %9 : vector<128x1xf32> to vector<128x128xf32>
    %c0_i32 = arith.constant 0 : i32
    %11 = vector.broadcast %c0_i32 : i32 to vector<128x1xi32>
    %12 = arith.cmpi sgt, %2, %11 : vector<128x1xi32>
    %c1_i32 = arith.constant 1 : i32
    %13 = tpu.dynamic_rotate %10 by %c1_i32 dim 0 : vector<128x128xf32>, i32 -> vector<128x128xf32>
    %cst = arith.constant 0.000000e+00 : f32
    %14 = vector.shape_cast %12 : vector<128x1xi1> to vector<128x1xi1>
    %15 = vector.broadcast %14 : vector<128x1xi1> to vector<128x128xi1>
    %16 = vector.broadcast %cst : f32 to vector<128x128xf32>
    %17 = arith.select %15, %13, %16 : vector<128x128xi1>, vector<128x128xf32>
    %c63_i32_8 = arith.constant 63 : i32
    %18 = vector.broadcast %c63_i32_8 : i32 to vector<128x1xi32>
    %19 = arith.cmpi slt, %2, %18 : vector<128x1xi32>
    %c127_i32 = arith.constant 127 : i32
    %20 = tpu.dynamic_rotate %10 by %c127_i32 dim 0 : vector<128x128xf32>, i32 -> vector<128x128xf32>
    %cst_9 = arith.constant 0.000000e+00 : f32
    %21 = vector.shape_cast %19 : vector<128x1xi1> to vector<128x1xi1>
    %22 = vector.broadcast %21 : vector<128x1xi1> to vector<128x128xi1>
    %23 = vector.broadcast %cst_9 : f32 to vector<128x128xf32>
    %24 = arith.select %22, %20, %23 : vector<128x128xi1>, vector<128x128xf32>
    %c0_10 = arith.constant 0 : index
    %c0_11 = arith.constant 0 : index
    %c0_12 = arith.constant 0 : index
    %25 = vector.load %arg2[%c0_10, %c0_11, %c0_12] : memref<1x3x128xf32, #tpu.memory_space<vmem>>, vector<1x3x128xf32>
    %26 = vector.shape_cast %25 : vector<1x3x128xf32> to vector<3x128xf32>
    %27 = vector.extract_strided_slice %26 {offsets = [0, 0], sizes = [1, 128], strides = [1, 1]} : vector<3x128xf32> to vector<1x128xf32>
    %28 = vector.broadcast %27 : vector<1x128xf32> to vector<128x128xf32>
    %29 = arith.mulf %17, %28 : vector<128x128xf32>
    %30 = vector.extract_strided_slice %26 {offsets = [1, 0], sizes = [1, 128], strides = [1, 1]} : vector<3x128xf32> to vector<1x128xf32>
    %31 = vector.broadcast %30 : vector<1x128xf32> to vector<128x128xf32>
    %32 = arith.mulf %10, %31 : vector<128x128xf32>
    %33 = arith.addf %29, %32 : vector<128x128xf32>
    %34 = vector.extract_strided_slice %26 {offsets = [2, 0], sizes = [1, 128], strides = [1, 1]} : vector<3x128xf32> to vector<1x128xf32>
    %35 = vector.broadcast %34 : vector<1x128xf32> to vector<128x128xf32>
    %36 = arith.mulf %24, %35 : vector<128x128xf32>
    %37 = arith.addf %33, %36 : vector<128x128xf32>
    %38 = vector.extract_strided_slice %4 {offsets = [0, 0], sizes = [1, 128], strides = [1, 1]} : vector<4x128xf32> to vector<1x128xf32>
    %39 = vector.broadcast %38 : vector<1x128xf32> to vector<128x128xf32>
    %40 = arith.mulf %37, %39 : vector<128x128xf32>
    %41 = vector.extract_strided_slice %6 {offsets = [0, 0], sizes = [1, 128], strides = [1, 1]} : vector<4x128xf32> to vector<1x128xf32>
    %42 = vector.broadcast %41 : vector<1x128xf32> to vector<128x128xf32>
    %43 = arith.addf %40, %42 : vector<128x128xf32>
    %cst_13 = arith.constant 0.000000e+00 : f32
    %44 = vector.broadcast %cst_13 : f32 to vector<128x128xf32>
    %45 = arith.cmpf oge, %43, %44 : vector<128x128xf32>
    %cst_14 = arith.constant 0.00999999977 : f32
    %46 = vector.broadcast %cst_14 : f32 to vector<128x128xf32>
    %47 = arith.mulf %46, %43 : vector<128x128xf32>
    %48 = arith.select %45, %43, %47 : vector<128x128xi1>, vector<128x128xf32>
    %c127_i32_15 = arith.constant 127 : i32
    %49 = tpu.dynamic_rotate %48 by %c127_i32_15 dim 0 : vector<128x128xf32>, i32 -> vector<128x128xf32>
    %50 = arith.maximumf %48, %49 : vector<128x128xf32>
    %c63_i32_16 = arith.constant 63 : i32
    %51 = vector.broadcast %c63_i32_16 : i32 to vector<128x1xi32>
    %52 = arith.cmpi slt, %2, %51 : vector<128x1xi32>
    %cst_17 = arith.constant 0.000000e+00 : f32
    %53 = vector.shape_cast %52 : vector<128x1xi1> to vector<128x1xi1>
    %54 = vector.broadcast %53 : vector<128x1xi1> to vector<128x128xi1>
    %55 = vector.broadcast %cst_17 : f32 to vector<128x128xf32>
    %56 = arith.select %54, %50, %55 : vector<128x128xi1>, vector<128x128xf32>
    %c0_18 = arith.constant 0 : index
    %c0_19 = arith.constant 0 : index
    %57 = vector.load %arg8[%c0_18, %c0_19] : memref<128x128xf32, #tpu.memory_space<vmem>>, vector<128x128xf32>
    tpu.vector_store %arg8[%c0_18, %c0_19], %56 {strides = array<i32>} : memref<128x128xf32, #tpu.memory_space<vmem>>, vector<128x128xf32>,
    %c0_20 = arith.constant 0 : index
    %c0_21 = arith.constant 0 : index
    %58 = vector.load %arg8[%c0_20, %c0_21] : memref<128x128xf32, #tpu.memory_space<vmem>>, vector<128x128xf32>
    %c1_i32_22 = arith.constant 1 : i32
    %59 = tpu.dynamic_rotate %58 by %c1_i32_22 dim 0 : vector<128x128xf32>, i32 -> vector<128x128xf32>
    %c127_i32_23 = arith.constant 127 : i32
    %60 = tpu.dynamic_rotate %58 by %c127_i32_23 dim 0 : vector<128x128xf32>, i32 -> vector<128x128xf32>
    %c32_i32 = arith.constant 32 : i32
    %61 = tpu.dynamic_rotate %58 by %c32_i32 dim 1 : vector<128x128xf32>, i32 -> vector<128x128xf32>
    %62 = arith.addf %59, %61 : vector<128x128xf32>
    %c64_i32 = arith.constant 64 : i32
    %63 = tpu.dynamic_rotate %60 by %c64_i32 dim 1 : vector<128x128xf32>, i32 -> vector<128x128xf32>
    %64 = arith.addf %62, %63 : vector<128x128xf32>
    %c0_24 = arith.constant 0 : index
    %c0_25 = arith.constant 0 : index
    %c0_26 = arith.constant 0 : index
    %c0_27 = arith.constant 0 : index
    %65 = vector.load %arg3[%c0_24, %c0_25, %c0_26, %c0_27] : memref<1x3x384x128xbf16, #tpu.memory_space<vmem>>, vector<1x1x128x128xbf16>
    %66 = vector.shape_cast %65 : vector<1x1x128x128xbf16> to vector<128x128xbf16>
    %67 = arith.truncf %64 : vector<128x128xf32> to vector<128x128xbf16>
    %cst_28 = arith.constant dense<0.000000e+00> : vector<128x128xf32>
    %68 = tpu.matmul %67, %66, %cst_28 {dimension_numbers = #tpu.dot_dimension_numbers<[1], [0], [0], [1], [0, 0, 1, 1], [], []>} : vector<128x128xbf16>, vector<128x128xbf16>, vector<128x128xf32> -> vector<128x128xf32>
    %69 = vector.extract_strided_slice %4 {offsets = [1, 0], sizes = [1, 128], strides = [1, 1]} : vector<4x128xf32> to vector<1x128xf32>
    %70 = vector.broadcast %69 : vector<1x128xf32> to vector<128x128xf32>
    %71 = arith.mulf %68, %70 : vector<128x128xf32>
    %72 = vector.extract_strided_slice %6 {offsets = [1, 0], sizes = [1, 128], strides = [1, 1]} : vector<4x128xf32> to vector<1x128xf32>
    %73 = vector.broadcast %72 : vector<1x128xf32> to vector<128x128xf32>
    %74 = arith.addf %71, %73 : vector<128x128xf32>
    %cst_29 = arith.constant 0.000000e+00 : f32
    %75 = vector.broadcast %cst_29 : f32 to vector<128x128xf32>
    %76 = arith.cmpf oge, %74, %75 : vector<128x128xf32>
    %cst_30 = arith.constant 0.00999999977 : f32
    %77 = vector.broadcast %cst_30 : f32 to vector<128x128xf32>
    %78 = arith.mulf %77, %74 : vector<128x128xf32>
    %79 = arith.select %76, %74, %78 : vector<128x128xi1>, vector<128x128xf32>
    %c127_i32_31 = arith.constant 127 : i32
    %80 = tpu.dynamic_rotate %79 by %c127_i32_31 dim 0 : vector<128x128xf32>, i32 -> vector<128x128xf32>
    %81 = arith.maximumf %79, %80 : vector<128x128xf32>
    %c62_i32 = arith.constant 62 : i32
    %82 = vector.broadcast %c62_i32 : i32 to vector<128x1xi32>
    %83 = arith.cmpi slt, %2, %82 : vector<128x1xi32>
    %cst_32 = arith.constant 0.000000e+00 : f32
    %84 = vector.shape_cast %83 : vector<128x1xi1> to vector<128x1xi1>
    %85 = vector.broadcast %84 : vector<128x1xi1> to vector<128x128xi1>
    %86 = vector.broadcast %cst_32 : f32 to vector<128x128xf32>
    %87 = arith.select %85, %81, %86 : vector<128x128xi1>, vector<128x128xf32>
    %c0_33 = arith.constant 0 : index
    %c0_34 = arith.constant 0 : index
    %88 = vector.load %arg8[%c0_33, %c0_34] : memref<128x128xf32, #tpu.memory_space<vmem>>, vector<128x128xf32>
    tpu.vector_store %arg8[%c0_33, %c0_34], %87 {strides = array<i32>} : memref<128x128xf32, #tpu.memory_space<vmem>>, vector<128x128xf32>,
    %c0_35 = arith.constant 0 : index
    %c0_36 = arith.constant 0 : index
    %89 = vector.load %arg8[%c0_35, %c0_36] : memref<128x128xf32, #tpu.memory_space<vmem>>, vector<128x128xf32>
    %c1_i32_37 = arith.constant 1 : i32
    %90 = tpu.dynamic_rotate %89 by %c1_i32_37 dim 0 : vector<128x128xf32>, i32 -> vector<128x128xf32>
    %c127_i32_38 = arith.constant 127 : i32
    %91 = tpu.dynamic_rotate %89 by %c127_i32_38 dim 0 : vector<128x128xf32>, i32 -> vector<128x128xf32>
    %c64_i32_39 = arith.constant 64 : i32
    %92 = tpu.dynamic_rotate %89 by %c64_i32_39 dim 1 : vector<128x128xf32>, i32 -> vector<128x128xf32>
    %93 = arith.addf %90, %92 : vector<128x128xf32>
    %94 = tpu.concatenate %93, %91 in 1 : vector<128x128xf32>, vector<128x128xf32> -> vector<128x256xf32>
    %c0_40 = arith.constant 0 : index
    %c1 = arith.constant 1 : index
    %c0_41 = arith.constant 0 : index
    %c0_42 = arith.constant 0 : index
    %95 = vector.load %arg3[%c0_40, %c1, %c0_41, %c0_42] : memref<1x3x384x128xbf16, #tpu.memory_space<vmem>>, vector<1x1x256x128xbf16>
    %96 = vector.shape_cast %95 : vector<1x1x256x128xbf16> to vector<256x128xbf16>
    %97 = arith.truncf %94 : vector<128x256xf32> to vector<128x256xbf16>
    %cst_43 = arith.constant dense<0.000000e+00> : vector<128x128xf32>
    %98 = tpu.matmul %97, %96, %cst_43 {dimension_numbers = #tpu.dot_dimension_numbers<[1], [0], [0], [1], [0, 0, 1, 1], [], []>} : vector<128x256xbf16>, vector<256x128xbf16>, vector<128x128xf32> -> vector<128x128xf32>
    %99 = vector.extract_strided_slice %4 {offsets = [2, 0], sizes = [1, 128], strides = [1, 1]} : vector<4x128xf32> to vector<1x128xf32>
    %100 = vector.broadcast %99 : vector<1x128xf32> to vector<128x128xf32>
    %101 = arith.mulf %98, %100 : vector<128x128xf32>
    %102 = vector.extract_strided_slice %6 {offsets = [2, 0], sizes = [1, 128], strides = [1, 1]} : vector<4x128xf32> to vector<1x128xf32>
    %103 = vector.broadcast %102 : vector<1x128xf32> to vector<128x128xf32>
    %104 = arith.addf %101, %103 : vector<128x128xf32>
    %cst_44 = arith.constant 0.000000e+00 : f32
    %105 = vector.broadcast %cst_44 : f32 to vector<128x128xf32>
    %106 = arith.cmpf oge, %104, %105 : vector<128x128xf32>
    %cst_45 = arith.constant 0.00999999977 : f32
    %107 = vector.broadcast %cst_45 : f32 to vector<128x128xf32>
    %108 = arith.mulf %107, %104 : vector<128x128xf32>
    %109 = arith.select %106, %104, %108 : vector<128x128xi1>, vector<128x128xf32>
    %c127_i32_46 = arith.constant 127 : i32
    %110 = tpu.dynamic_rotate %109 by %c127_i32_46 dim 0 : vector<128x128xf32>, i32 -> vector<128x128xf32>
    %111 = arith.maximumf %109, %110 : vector<128x128xf32>
    %c61_i32 = arith.constant 61 : i32
    %112 = vector.broadcast %c61_i32 : i32 to vector<128x1xi32>
    %113 = arith.cmpi slt, %2, %112 : vector<128x1xi32>
    %cst_47 = arith.constant 0.000000e+00 : f32
    %114 = vector.shape_cast %113 : vector<128x1xi1> to vector<128x1xi1>
    %115 = vector.broadcast %114 : vector<128x1xi1> to vector<128x128xi1>
    %116 = vector.broadcast %cst_47 : f32 to vector<128x128xf32>
    %117 = arith.select %115, %111, %116 : vector<128x128xi1>, vector<128x128xf32>
    %c0_48 = arith.constant 0 : index
    %c0_49 = arith.constant 0 : index
    %118 = vector.load %arg8[%c0_48, %c0_49] : memref<128x128xf32, #tpu.memory_space<vmem>>, vector<128x128xf32>
    tpu.vector_store %arg8[%c0_48, %c0_49], %117 {strides = array<i32>} : memref<128x128xf32, #tpu.memory_space<vmem>>, vector<128x128xf32>,
    %c0_50 = arith.constant 0 : index
    %c0_51 = arith.constant 0 : index
    %119 = vector.load %arg8[%c0_50, %c0_51] : memref<128x128xf32, #tpu.memory_space<vmem>>, vector<128x128xf32>
    %c1_i32_52 = arith.constant 1 : i32
    %120 = tpu.dynamic_rotate %119 by %c1_i32_52 dim 0 : vector<128x128xf32>, i32 -> vector<128x128xf32>
    %c127_i32_53 = arith.constant 127 : i32
    %121 = tpu.dynamic_rotate %119 by %c127_i32_53 dim 0 : vector<128x128xf32>, i32 -> vector<128x128xf32>
    %122 = tpu.concatenate %120, %119, %121 in 1 : vector<128x128xf32>, vector<128x128xf32>, vector<128x128xf32> -> vector<128x384xf32>
    %c0_54 = arith.constant 0 : index
    %c2 = arith.constant 2 : index
    %c0_55 = arith.constant 0 : index
    %c0_56 = arith.constant 0 : index
    %123 = vector.load %arg3[%c0_54, %c2, %c0_55, %c0_56] : memref<1x3x384x128xbf16, #tpu.memory_space<vmem>>, vector<1x1x384x128xbf16>
    %124 = vector.shape_cast %123 : vector<1x1x384x128xbf16> to vector<384x128xbf16>
    %125 = arith.truncf %122 : vector<128x384xf32> to vector<128x384xbf16>
    %cst_57 = arith.constant dense<0.000000e+00> : vector<128x128xf32>
    %126 = tpu.matmul %125, %124, %cst_57 {dimension_numbers = #tpu.dot_dimension_numbers<[1], [0], [0], [1], [0, 0, 1, 1], [], []>} : vector<128x384xbf16>, vector<384x128xbf16>, vector<128x128xf32> -> vector<128x128xf32>
    %127 = vector.extract_strided_slice %4 {offsets = [3, 0], sizes = [1, 128], strides = [1, 1]} : vector<4x128xf32> to vector<1x128xf32>
    %128 = vector.broadcast %127 : vector<1x128xf32> to vector<128x128xf32>
    %129 = arith.mulf %126, %128 : vector<128x128xf32>
    %130 = vector.extract_strided_slice %6 {offsets = [3, 0], sizes = [1, 128], strides = [1, 1]} : vector<4x128xf32> to vector<1x128xf32>
    %131 = vector.broadcast %130 : vector<1x128xf32> to vector<128x128xf32>
    %132 = arith.addf %129, %131 : vector<128x128xf32>
    %cst_58 = arith.constant 0.000000e+00 : f32
    %133 = vector.broadcast %cst_58 : f32 to vector<128x128xf32>
    %134 = arith.cmpf oge, %132, %133 : vector<128x128xf32>
    %cst_59 = arith.constant 0.00999999977 : f32
    %135 = vector.broadcast %cst_59 : f32 to vector<128x128xf32>
    %136 = arith.mulf %135, %132 : vector<128x128xf32>
    %137 = arith.select %134, %132, %136 : vector<128x128xi1>, vector<128x128xf32>
    %c127_i32_60 = arith.constant 127 : i32
    %138 = tpu.dynamic_rotate %137 by %c127_i32_60 dim 0 : vector<128x128xf32>, i32 -> vector<128x128xf32>
    %139 = arith.maximumf %137, %138 : vector<128x128xf32>
    %c60_i32 = arith.constant 60 : i32
    %140 = vector.broadcast %c60_i32 : i32 to vector<128x1xi32>
    %141 = arith.cmpi slt, %2, %140 : vector<128x1xi32>
    %cst_61 = arith.constant 0.000000e+00 : f32
    %142 = vector.shape_cast %141 : vector<128x1xi1> to vector<128x1xi1>
    %143 = vector.broadcast %142 : vector<128x1xi1> to vector<128x128xi1>
    %144 = vector.broadcast %cst_61 : f32 to vector<128x128xf32>
    %145 = arith.select %143, %139, %144 : vector<128x128xi1>, vector<128x128xf32>
    %c0_62 = arith.constant 0 : index
    %c0_63 = arith.constant 0 : index
    %146 = vector.load %arg8[%c0_62, %c0_63] : memref<128x128xf32, #tpu.memory_space<vmem>>, vector<128x128xf32>
    tpu.vector_store %arg8[%c0_62, %c0_63], %145 {strides = array<i32>} : memref<128x128xf32, #tpu.memory_space<vmem>>, vector<128x128xf32>,
    %c0_64 = arith.constant 0 : index
    %c0_65 = arith.constant 0 : index
    %147 = vector.load %arg8[%c0_64, %c0_65] : memref<128x128xf32, #tpu.memory_space<vmem>>, vector<64x128xf32>
    %cst_66 = arith.constant dense<0.000000e+00> : vector<128xf32>
    %148 = vector.multi_reduction <add>, %147, %cst_66 [0] : vector<64x128xf32> to vector<128xf32>
    %149 = vector.shape_cast %148 : vector<128xf32> to vector<1x128xf32>
    %c64 = arith.constant 64 : index
    %c0_67 = arith.constant 0 : index
    %150 = vector.load %arg8[%c64, %c0_67] : memref<128x128xf32, #tpu.memory_space<vmem>>, vector<64x128xf32>
    %cst_68 = arith.constant dense<0.000000e+00> : vector<128xf32>
    %151 = vector.multi_reduction <add>, %150, %cst_68 [0] : vector<64x128xf32> to vector<128xf32>
    %152 = vector.shape_cast %151 : vector<128xf32> to vector<1x128xf32>
    %153 = tpu.concatenate %149, %152 in 0 : vector<1x128xf32>, vector<1x128xf32> -> vector<2x128xf32>
    %cst_69 = arith.constant 0.0166666675 : f32
    %154 = vector.broadcast %cst_69 : f32 to vector<2x128xf32>
    %155 = arith.mulf %153, %154 : vector<2x128xf32>
    %c0_70 = arith.constant 0 : index
    %c0_71 = arith.constant 0 : index
    %c0_72 = arith.constant 0 : index
    %156 = vector.load %arg6[%c0_70, %c0_71, %c0_72] : memref<1x128x128xf32, #tpu.memory_space<vmem>>, vector<1x128x128xf32>
    %157 = vector.shape_cast %156 : vector<1x128x128xf32> to vector<128x128xf32>
    %cst_73 = arith.constant dense<0.000000e+00> : vector<2x128xf32>
    %158 = tpu.matmul %155, %157, %cst_73 {dimension_numbers = #tpu.dot_dimension_numbers<[1], [0], [0], [1], [0, 0, 1, 1], [], []>} : vector<2x128xf32>, vector<128x128xf32>, vector<2x128xf32> -> vector<2x128xf32>
    %c0_74 = arith.constant 0 : index
    %c0_75 = arith.constant 0 : index
    %c0_76 = arith.constant 0 : index
    %159 = vector.load %arg7[%c0_74, %c0_75, %c0_76] : memref<1x2x128xf32, #tpu.memory_space<vmem>>, vector<1x2x128xf32>
    %160 = vector.shape_cast %159 : vector<1x2x128xf32> to vector<2x128xf32>
    %161 = vector.shape_cast %158 : vector<2x128xf32> to vector<1x2x128xf32>
    tpu.vector_store %arg7[%c0_74, %c0_75, %c0_76], %161 {strides = array<i32>} : memref<1x2x128xf32, #tpu.memory_space<vmem>>, vector<1x2x128xf32>,
    return
  }
  func.func @transform_0(%arg0: i32) -> (i32, i32, i32) {
    %c0_i32 = arith.constant 0 : i32
    %c0_i32_0 = arith.constant 0 : i32
    %c0_i32_1 = arith.constant 0 : i32
    return %arg0, %c0_i32, %c0_i32_0 : i32, i32, i32
  }
  func.func @transform_1(%arg0: i32) -> (i32, i32, i32) {
    %c0_i32 = arith.constant 0 : i32
    %c0_i32_0 = arith.constant 0 : i32
    %c0_i32_1 = arith.constant 0 : i32
    return %arg0, %c0_i32, %c0_i32_0 : i32, i32, i32
  }
  func.func @transform_2(%arg0: i32) -> (i32, i32, i32, i32) {
    %c0_i32 = arith.constant 0 : i32
    %c0_i32_0 = arith.constant 0 : i32
    %c0_i32_1 = arith.constant 0 : i32
    %c0_i32_2 = arith.constant 0 : i32
    return %arg0, %c0_i32, %c0_i32_0, %c0_i32_1 : i32, i32, i32, i32
  }
  func.func @transform_3(%arg0: i32) -> (i32, i32, i32) {
    %c0_i32 = arith.constant 0 : i32
    %c0_i32_0 = arith.constant 0 : i32
    %c0_i32_1 = arith.constant 0 : i32
    return %arg0, %c0_i32, %c0_i32_0 : i32, i32, i32
  }
  func.func @transform_4(%arg0: i32) -> (i32, i32, i32) {
    %c0_i32 = arith.constant 0 : i32
    %c0_i32_0 = arith.constant 0 : i32
    %c0_i32_1 = arith.constant 0 : i32
    return %arg0, %c0_i32, %c0_i32_0 : i32, i32, i32
  }
  func.func @transform_5(%arg0: i32) -> (i32, i32, i32) {
    %c0_i32 = arith.constant 0 : i32
    %c0_i32_0 = arith.constant 0 : i32
    %c0_i32_1 = arith.constant 0 : i32
    return %arg0, %c0_i32, %c0_i32_0 : i32, i32, i32
  }
  func.func @transform_6(%arg0: i32) -> (i32, i32, i32) {
    %c0_i32 = arith.constant 0 : i32
    %c0_i32_0 = arith.constant 0 : i32
    %c0_i32_1 = arith.constant 0 : i32
    return %arg0, %c0_i32, %c0_i32_0 : i32, i32, i32
  }
}

</mosaic_0001>

<bundles_post_ra>
// kernel: tpu_custom_call.1
= control target key start
LH: loop header
LB: loop body
LE: loop exit
PB: predicated region body
PF: predicated region fallthrough
CT: control target
= control target key end

     0   :  { %11 = vsyncpa [#allocation4], 0  ;;  %s4988_s0 = inlined_call_operand.vmem [shape: f32[2,128,1], index: 0, kind: input, shape index: {}]   ;;  %s4989_s1 = inlined_call_operand.vmem [shape: f32[2,3,128], index: 1, kind: input, shape index: {}]   ;;  %s4990_s2 = inlined_call_operand.hbm [shape: bf16[2,3,384,128], index: 2, kind: input, shape index: {}]   ;;  %s4991_s3 = inlined_call_operand.vmem [shape: f32[2,4,128], index: 3, kind: input, shape index: {}]   ;;  %s4992_s4 = inlined_call_operand.vmem [shape: f32[2,4,128], index: 4, kind: input, shape index: {}]   ;;  %s4993_s5 = inlined_call_operand.vmem [shape: f32[2,128,128], index: 5, kind: input, shape index: {}]   ;;  %s4994_s6 = inlined_call_operand.hbm [shape: f32[2,2,128], index: 6, kind: output, shape index: {}]  }
   0x1   :  { %13 = vsyncpa [#allocation4 + $0x1], 0 }
   0x2   :  { %14 = vsyncpa [#allocation5], 0 }
   0x3   :  { %16 = vsyncpa [#allocation5 + $0x1], 0  ;;  %s3464_s21 = smov 0   ;;  %s3466_s22 = smov 0  }
   0x4   :  { %s3468_s23 = smov 0   ;;  %s3470_s24 = smov 0  }
   0x5 LB: > { %s3485_s25 = sadd.s32 4294967295, %s3421_s24   ;;  %s2904_s26 = sadd.s32 4294967294, %s3421_s24   ;;  %s3421_s24 = sphi %s3470_s24, %s5008_s24   ;;  %s3417_s23 = sphi %s3468_s23, %s5007_s23   ;;  %s3413_s22 = sphi %s3466_s22, %s5006_s22   ;;  %s3409_s21 = sphi %s3464_s21, %s5005_s21  }
   0x6   : > { %s3489_s27 = sadd.s32 1, %s3421_s24   ;;  %s81_s28 = sadd.s32 1, %s3417_s23 }
   0x7   : > { %s78_s29 = ssub.s32 %s3421_s24, %s3489_s27  ;;  %p88_p0 = scmp.ne.s32.totalorder %s3417_s23, %s3413_s22 }
   0x8   : > { %p79_p1 = scmp.eq.s32.totalorder %s78_s29, 0  ;;  %p89_p2 = scmp.eq.s32.totalorder %s3421_s24, 0 }
   0x9   : > { %p94_p3 = scmp.ne.s32.totalorder %s3413_s22, %s3409_s21  ;;  %p95_p4 = scmp.eq.s32.totalorder %s3485_s25, 0 }
   0xa   : > { %s3501_s30 = scalar_select %p79_p1, %s3417_s23, %s81_s28  }
   0xb   : > { %p90_p5 = por %p89_p2, %p88_p0  ;;  %p3503_p6 = por %p95_p4, %p94_p3 }
   0xc   : > { %4995 = sst [smem:[#allocation9_spill]] %s3501_s30  ;;  %p196_p7 = scmp.eq.s32.totalorder %s3485_s25, 1 }
   0xd   : > { %p202_p8 = scmp.eq.s32.totalorder %s2904_s26, 1  ;;  %p2906_p9 = scmp.ge.s32.totalorder %s3421_s24, 2 }
   0xe   : > { %p3280_p10 = scmp.lt.s32.totalorder %s3421_s24, 2  ;;  %p3510_p11 = por %p196_p7, %p88_p0 }
   0xf   : > { %p3514_p12 = por %p202_p8, %p94_p3  ;;  %s237_s10 = sand.u32 1, %s3417_s23  }
  0x10   : > { %s3266_s11 = smul.u32 576, %s3421_s24  ;;  %p3523_p13 = pnand %p3280_p10, %p90_p5 }
  0x11   : > { %s3265_s12 = smul.u32 576, %s237_s10  ;;  %s238_s20 = scalar_lea.sflag [#allocation4], %s237_s10 }
  0x12   : > { %s246_s15 = scalar_lea.hbm %s4990_s2, %s3266_s11  ;;  %p3329_p1 = pneg %p3523_p13 }
  0x13   : > { %s247_s17 = sshll.u32 %s246_s15, 4  ;;  %s241_s18 = scalar_lea.vmem [#allocation3], %s3265_s12  ;;  %s248_s17 = int_to_ptr.hbm [resolvable:$true] %s247_s17 }
  0x14   : > { %s249_s19 = sshll.u32 %s241_s18, 4  ;;  %s3325_s26 = sshra.s32 %s248_s17, 4  ;;  %s250_s19 = int_to_ptr.vmem [resolvable:$true] %s249_s19  ;;  %s3326_s26 = int_to_ptr.hbm [resolvable:$true] %s3325_s26 }
  0x15   : > { %s3327_s28 = scalar_lea.hbm %s3326_s26, 576  ;;  %s3332_s13 = scalar_lea.hbm %s4990_s2, 1152 }
  0x16   : > { %p3328_p0 = scmp.ne.s32.totalorder %s3326_s26, %s3327_s28  ;;  %p3333_p4 = scmp.lt.s32.totalorder %s3326_s26, %s4990_s2 }
  0x17   : > { %p3334_p5 = scmp.lt.s32.totalorder %s3332_s13, %s3327_s28 }
  0x18   : > { %p3330_p2 = pnand %p3329_p1, %p3328_p0 }
  0x19   : > { %p3335_p7 = por %p3334_p5, %p3333_p4 }
  0x1a   : > { %p3331_p3 = pneg %p3330_p2 }
  0x1c   : > { %p3336_p8 = pnand %p3335_p7, %p3331_p3 }
  0x1e   : > { %3339 = shalt.err (!%p3336_p8)
}
  0x1f   : > { %s3423_s10 = smov 64   ;;  %s3424_s12 = smov 4  }
  0x20   : > { %3275 = dma.hbm_to_vmem [thread:$0]  (!%p3523_p13), %s248_s17, 9216, %s250_s19, %s238_s20, %s3423_s10, %s3423_s10, %s3424_s12  }
  0x21   : > { %p2908_p10 = scmp.ge.s32.totalorder %s3421_s24, 1  ;;  %p279_p0 = scmp.lt.s32.totalorder %s3421_s24, 3 }
  0x23   : > { %p280_p1 = pnand %p2908_p10, %p279_p0 }
  0x24   : > { %s3540_s15 = sand.u32 (!%p280_p1), 1, %s3413_s22  }
  0x25   : > { %283 = sbr.rel (%p280_p1) target bundleno = 1390 (0x56e), region = 44  ;;  %s286_s18 = scalar_lea.sflag (!%p280_p1), [#allocation4], %s3540_s15 }
  0x26   : > { %s3267_s30 = smul.u32 (!%p280_p1), 576, %s3540_s15 }
  0x28   : > { %s3544_s26 = scalar_lea.vmem (!%p280_p1), [#allocation3], %s3267_s30 }
  0x2a   : > { %3400 = dma.done.wait (%p3503_p6), %s286_s18, 9216  }
  0x2b   : > { %3402 = vsyncadd (%p3503_p6), %s286_s18, 4294958080  ;;  %p341_p13 = scmp.lt.s32.totalorder %s3485_s25, 1  ;;  %v3425_v0 = vmov 0   ;;  %v363_v19 = vlaneseq  ;;  %s3426_s20 = smov 32  }
  0x2c   : > { %3322 = vset.pattern.permute.xlu2 %v3425_v0  ;;  %3321 = vset.pattern.permute.xlu1 %v3425_v0  ;;  %s2759_s18 = scalar_lea.sflag [#allocation5], %s3540_s15 }
  0x2d   : > { %3320 = vset.pattern.permute.xlu0 %v3425_v0  ;;  %s3552_s16 = scalar_select %p341_p13, %s3485_s25, 1  ;;  %v3584_v20 = vshrl.u32 %v363_v19, 7 }
  0x2f   : > { %s3193_s17 = sshll.u32 %s3552_s16, 7  ;;  %s2912_s7 = sshll.u32 %s3552_s16, 2  ;;  %vm526_vm0 = vcmp.lt.s32.totalorder %v3584_v20, 1  ;;  %v379_v36 = vadd.s32 120, %v3584_v20  ;;  %vm623_vm1 = vcmp.lt.s32.totalorder %v3584_v20, 7  ;;  %v380_v45 = vand.u32 63, %v3584_v20 }
  0x30   : > { %s3560_s28 = scalar_lea.vmem %s4988_s0, %s3193_s17  ;;  %s349_s13 = scalar_lea.vmem %s4989_s1, %s2912_s7 }
  0x31   : > { %v401_v1 = vld [vmem:[%s3560_s28 + $0x18] sm:$0xff]  ;;  %v399_v2 = vld [vmem:[%s3560_s28 + $0x8] sm:$0xff]  ;;  %v398_v3 = vld [vmem:[%s3560_s28] sm:$0xff]  ;;  %s3601_s12 = scalar_lea.vmem %s4991_s3, %s2912_s7  ;;  %s3608_s19 = scalar_lea.vmem %s4992_s4, %s2912_s7  ;;  %v3643_v53 = vand.u32 63, %v379_v36  ;;  %vm3652_vm2 = vcmp.gt.s32.totalorder %v380_v45, 0 }
  0x32   : > { %431 = vperm.xlu2 %3322, %v401_v1   ;;  %421 = vperm.xlu1 %3321, %v399_v2   ;;  %v402_v4 = vld [vmem:[%s3560_s28 + $0x20] sm:$0xff]  ;;  %v400_v5 = vld [vmem:[%s3560_s28 + $0x10] sm:$0xff]  ;;  %v413_v6 = vld [vmem:[%s3560_s28 + $0x78] sm:$0xff]  ;;  %s4859_s29 = scalar_lea.vmem %s4993_s5, %s3193_s17  ;;  %s2909_s16 = sshll.u32 %s3540_s15, 1 }
  0x33   : > { %416 = vperm.xlu0 %3320, %v398_v3   ;;  %v409_v7 = vld [vmem:[%s3560_s28 + $0x58] sm:$0xff]  ;;  %v408_v8 = vld [vmem:[%s3560_s28 + $0x50] sm:$0xff]  ;;  %v407_v9 = vld [vmem:[%s3560_s28 + $0x48] sm:$0xff]  ;;  %vm606_vm3 = vcmp.lt.s32.totalorder %v3643_v53, 63  ;;  %s3190_s17 = sshll.u32 %s3485_s25, 1  ;;  %s340_s10 = scalar_lea.vmem [#allocation6], %s2909_s16 }
  0x34   : > { %v403_v10 = vld [vmem:[%s3560_s28 + $0x28] sm:$0xff]  ;;  %v410_v12 = vld [vmem:[%s3560_s28 + $0x60] sm:$0xff]  ;;  %v405_v13 = vld [vmem:[%s3560_s28 + $0x38] sm:$0xff]  ;;  %s2769_s14 = scalar_lea.hbm %s4994_s6, %s3190_s17 }
  0x35   : > { %v411_v11 = vld [vmem:[%s3560_s28 + $0x68] sm:$0xff]  ;;  %v404_v14 = vld [vmem:[%s3560_s28 + $0x30] sm:$0xff]  ;;  %v406_v16 = vld [vmem:[%s3560_s28 + $0x40] sm:$0xff]  ;;  %s2773_s30 = sshll.u32 %s2769_s14, 4  ;;  %s2774_s30 = int_to_ptr.hbm [resolvable:$true] %s2773_s30 }
  0x36   : > { %v412_v15 = vld [vmem:[%s3560_s28 + $0x70] sm:$0xff]  ;;  %v688_v24 = vld [vmem:[%s349_s13] sm:$0x7]  ;;  %s3427_s28 = smov 64  }
  0x37   : > { %v3594_v26 = vperm.slane %v688_v24, 0  ;;  %v3596_v27 = vperm.slane %v688_v24, 1  ;;  %v3613_v32 = vld [vmem:[%s3601_s12] sm:$0xf]  ;;  %v3619_v37 = vperm.slane %v688_v24, 2 }
  0x38   : > { %v3622_v38 = vld [vmem:[%s3608_s19] sm:$0xf]  ;;  %v3635_v46 = vperm.slane %v3613_v32, 0 }
  0x39   : > { %v3639_v50 = vperm.slane %v3622_v38, 0 }
  0x3a   : > { %436 = vperm.xlu2 %3322, %v402_v4   ;;  %426 = vperm.xlu1 %3321, %v400_v5  }
  0x3b   : > { %491 = vperm.xlu0 %3320, %v413_v6  }
  0x42   : > { %471 = vperm.xlu2 %3322, %v409_v7   ;;  %466 = vperm.xlu1 %3321, %v408_v8  }
  0x43   : > { %461 = vperm.xlu0 %3320, %v407_v9  }
  0x4a   : > { %441 = vperm.xlu2 %3322, %v403_v10   ;;  %481 = vperm.xlu1 %3321, %v411_v11  }
  0x4b   : > { %476 = vperm.xlu0 %3320, %v410_v12  }
  0x52   : > { %451 = vperm.xlu2 %3322, %v405_v13   ;;  %446 = vperm.xlu1 %3321, %v404_v14  }
  0x53   : > { %486 = vperm.xlu0 %3320, %v412_v15  }
  0x5b   : > { %456 = vperm.xlu0 %3320, %v406_v16  }
  0x8c   : > { %v3578_v17 = vpop.permute.xlu2 %431 }
  0x8d   : > { %v513_v21 = vrot.slane %v3578_v17, 7  ;;  %v610_v33 = vrot.slane %v3578_v17, 1  ;;  %v710_v58 = vmul.f32 %v3596_v27, %v3578_v17 }
  0x94   : > { %v437_v18 = vpop.permute.xlu2 %436 }
  0x95   : > { %v514_v22 = vrot.slane %v437_v18, 7  ;;  %v711_v29 = vmul.f32 %v3596_v27, %v437_v18  ;;  %v611_v30 = vrot.slane %v437_v18, 1 }
  0x97   : > { %v538_v25 = vsel %vm526_vm0, %v513_v21, %v514_v22  ;;  %v635_v51 = vsel %vm623_vm1, %v610_v33, %v611_v30 }
  0x98   : > { %v694_v28 = vmul.f32 %v3594_v26, %v538_v25  ;;  %v743_v0 = vmul.f32 %v3619_v37, %v635_v51 }
  0x9a   : > { %v727_v39 = vadd.f32 %v711_v29, %v694_v28 }
  0x9c   : > { %v3587_v23 = vpop.permute.xlu2 %471 }
  0x9d   : > { %v521_v1 = vrot.slane %v3587_v23, 7  ;;  %v618_v2 = vrot.slane %v3587_v23, 1  ;;  %v3669_v4 = vmul.f32 %v3596_v27, %v3587_v23 }
  0xa4   : > { %v3610_v31 = vpop.permute.xlu2 %441  ;;  %v422_v40 = vpop.permute.xlu1 %421 }
  0xa5   : > { %v515_v34 = vrot.slane %v3610_v31, 7  ;;  %v612_v35 = vrot.slane %v3610_v31, 1  ;;  %v417_v41 = vpop.permute.xlu0 %416  ;;  %v511_v44 = vrot.slane %v422_v40, 7  ;;  %v608_v48 = vrot.slane %v422_v40, 1 }
  0xa6   : > { %v510_v49 = vrot.slane %v417_v41, 7  ;;  %v607_v52 = vrot.slane %v417_v41, 1  ;;  %v712_v55 = vmul.f32 %v3596_v27, %v3610_v31  ;;  %v708_v61 = vmul.f32 %v3596_v27, %v422_v40 }
  0xa7   : > { %v537_v42 = vsel %vm526_vm0, %v514_v22, %v515_v34  ;;  %v634_v43 = vsel %vm623_vm1, %v611_v30, %v612_v35  ;;  %v707_v6 = vmul.f32 %v3596_v27, %v417_v41 }
  0xa8   : > { %v744_v47 = vmul.f32 %v3619_v37, %v634_v43  ;;  %v695_v54 = vmul.f32 %v3594_v26, %v537_v42  ;;  %v541_v57 = vsel %vm526_vm0, %v510_v49, %v511_v44  ;;  %v638_v62 = vsel %vm623_vm1, %v607_v52, %v608_v48 }
  0xa9   : > { %v691_v63 = vmul.f32 %v3594_v26, %v541_v57  ;;  %v740_v10 = vmul.f32 %v3619_v37, %v638_v62 }
  0xaa   : > { %v760_v56 = vadd.f32 %v744_v47, %v727_v39  ;;  %v3671_v5 = vadd.f32 %v712_v55, %v695_v54 }
  0xab   : > { %v724_v14 = vadd.f32 %v708_v61, %v691_v63 }
  0xac   : > { %v777_v60 = vmul.f32 %v3635_v46, %v760_v56  ;;  %v3664_v3 = vpop.permute.xlu2 %451  ;;  %v427_v7 = vpop.permute.xlu1 %426 }
  0xad   : > { %v3674_v8 = vpop.permute.xlu0 %491  ;;  %v512_v11 = vrot.slane %v427_v7, 7  ;;  %v609_v12 = vrot.slane %v427_v7, 1  ;;  %v517_v15 = vrot.slane %v3664_v3, 7  ;;  %v709_v16 = vmul.f32 %v3596_v27, %v427_v7 }
  0xae   : > { %v794_v9 = vadd.f32 %v3639_v50, %v777_v60  ;;  %v525_v13 = vrot.slane %v3674_v8, 7  ;;  %v622_v18 = vrot.slane %v3674_v8, 1  ;;  %v614_v43 = vrot.slane %v3664_v3, 1 }
  0xaf   : > { %v539_v19 = vsel %vm526_vm0, %v512_v11, %v513_v21  ;;  %v540_v22 = vsel %vm526_vm0, %v511_v44, %v512_v11  ;;  %v636_v24 = vsel %vm623_vm1, %v609_v12, %v610_v33  ;;  %v637_v25 = vsel %vm623_vm1, %v608_v48, %v609_v12 }
  0xb0   : > { %v692_v28 = vmul.f32 %v3594_v26, %v540_v22  ;;  %v693_v29 = vmul.f32 %v3594_v26, %v539_v19  ;;  %v741_v30 = vmul.f32 %v3619_v37, %v637_v25  ;;  %v826_v36 = vmul.f32 0.01, %v794_v9 }
  0xb1   : > { %v742_v17 = vmul.f32 %v3619_v37, %v636_v24  ;;  %v542_v21 = vsel %vm526_vm0, %v525_v13, %v510_v49  ;;  %v639_v33 = vsel %vm623_vm1, %v622_v18, %v607_v52  ;;  %vm810_vm4 = vcmp.ge.f32.partialorder %v794_v9, 0.0 }
  0xb2   : > { %v725_v39 = vadd.f32 %v709_v16, %v692_v28  ;;  %v726_v40 = vadd.f32 %v710_v58, %v693_v29  ;;  %v757_v41 = vadd.f32 %v741_v30, %v724_v14  ;;  %v575_v42 = vsel %vm3652_vm2, %v542_v21, 0.0 }
  0xb3   : > { %v3709_v44 = vmul.f32 %v3596_v27, %v3664_v3  ;;  %v690_v45 = vmul.f32 %v3594_v26, %v575_v42  ;;  %v3714_v47 = vmul.f32 %v3596_v27, %v3674_v8  ;;  %v687_v51 = vsel %vm606_vm3, %v639_v33, 0.0 }
  0xb4   : > { %v758_v48 = vadd.f32 %v742_v17, %v725_v39  ;;  %v759_v49 = vadd.f32 %v743_v0, %v726_v40  ;;  %v467_v52 = vpop.permute.xlu1 %466  ;;  %v774_v55 = vmul.f32 %v3635_v46, %v757_v41  ;;  %v3722_v59 = vsel %vm810_vm4, %v794_v9, %v826_v36 }
  0xb5   : > { %v3718_v54 = vpop.permute.xlu0 %461  ;;  %v723_v56 = vadd.f32 %v707_v6, %v690_v45  ;;  %v520_v57 = vrot.slane %v467_v52, 7  ;;  %v617_v58 = vrot.slane %v467_v52, 1  ;;  %v3729_v0 = vmul.f32 %v3619_v37, %v687_v51 }
  0xb6   : > { %v775_v60 = vmul.f32 %v3635_v46, %v758_v48  ;;  %v776_v61 = vmul.f32 %v3635_v46, %v759_v49  ;;  %v519_v62 = vrot.slane %v3718_v54, 7  ;;  %v616_v63 = vrot.slane %v3718_v54, 1 }
  0xb7   : > { %v531_v6 = vsel %vm526_vm0, %v520_v57, %v521_v1  ;;  %v628_v7 = vsel %vm623_vm1, %v617_v58, %v618_v2  ;;  %v791_v9 = vadd.f32 %v3639_v50, %v774_v55  ;;  %v717_v12 = vmul.f32 %v3596_v27, %v467_v52 }
  0xb8   : > { %v701_v11 = vmul.f32 %v3594_v26, %v531_v6  ;;  %v532_v14 = vsel %vm526_vm0, %v519_v62, %v520_v57  ;;  %v629_v16 = vsel %vm623_vm1, %v616_v63, %v617_v58  ;;  %v3753_v22 = vmul.f32 %v3596_v27, %v3718_v54 }
  0xb9   : > { %v700_v19 = vmul.f32 %v3594_v26, %v532_v14  ;;  %v792_v24 = vadd.f32 %v3639_v50, %v775_v60  ;;  %v793_v25 = vadd.f32 %v3639_v50, %v776_v61  ;;  %v750_v28 = vmul.f32 %v3619_v37, %v628_v7 }
  0xba   : > { %vm807_vm5 = vcmp.ge.f32.partialorder %v791_v9, 0.0  ;;  %v823_v29 = vmul.f32 0.01, %v791_v9  ;;  %v756_v30 = vadd.f32 %v740_v10, %v723_v56  ;;  %v734_v36 = vadd.f32 %v3669_v4, %v701_v11 }
  0xbb   : > { %v3760_v17 = vmul.f32 %v3619_v37, %v629_v16  ;;  %vm808_vm6 = vcmp.ge.f32.partialorder %v792_v24, 0.0  ;;  %v824_v21 = vmul.f32 0.01, %v792_v24  ;;  %vm809_vm7 = vcmp.ge.f32.partialorder %v793_v25, 0.0 }
  0xbc   : > { %v3762_v33 = vpop.permute.xlu1 %481  ;;  %v825_v40 = vmul.f32 0.01, %v793_v25  ;;  %v3764_v41 = vsel %vm807_vm5, %v791_v9, %v823_v29  ;;  %v773_v42 = vmul.f32 %v3635_v46, %v756_v30  ;;  %v733_v45 = vadd.f32 %v717_v12, %v700_v19 }
  0xbd   : > { %v477_v39 = vpop.permute.xlu0 %476  ;;  %v523_v48 = vrot.slane %v3762_v33, 7  ;;  %v620_v10 = vrot.slane %v3762_v33, 1  ;;  %v371_v4 = vadd.s32 56, %v3584_v20  ;;  %v720_v49 = vmul.f32 %v3596_v27, %v3762_v33 }
  0xbe   : > { %v522_v51 = vrot.slane %v477_v39, 7  ;;  %v619_v52 = vrot.slane %v477_v39, 1  ;;  %v840_v55 = vsel %vm808_vm6, %v792_v24, %v824_v21  ;;  %v3772_v56 = vsel %vm809_vm7, %v793_v25, %v825_v40 }
  0xbf   : > { %v856_v57 = vrot.slane %v840_v55, 1  ;;  %v855_v58 = vrot.slane %v3764_v41, 1  ;;  %v790_v60 = vadd.f32 %v3639_v50, %v773_v42  ;;  %v719_v14 = vmul.f32 %v3596_v27, %v477_v39 }
  0xc0   : > { %v529_v61 = vsel %vm526_vm0, %v522_v51, %v523_v48  ;;  %v530_v6 = vsel %vm526_vm0, %v521_v1, %v522_v51  ;;  %v626_v7 = vsel %vm623_vm1, %v619_v52, %v620_v10  ;;  %v627_v9 = vsel %vm623_vm1, %v618_v2, %v619_v52 }
  0xc1   : > { %v702_v11 = vmul.f32 %v3594_v26, %v530_v6  ;;  %v703_v12 = vmul.f32 %v3594_v26, %v529_v61  ;;  %v751_v16 = vmul.f32 %v3619_v37, %v627_v9  ;;  %v857_v19 = vrot.slane %v3772_v56, 1 }
  0xc2   : > { %v883_v1 = vsel %vm623_vm1, %v855_v58, %v856_v57  ;;  %vm806_vm8 = vcmp.ge.f32.partialorder %v790_v60, 0.0  ;;  %v822_v23 = vmul.f32 0.01, %v790_v60  ;;  %v752_v2 = vmul.f32 %v3619_v37, %v626_v7 }
  0xc3   : > { %v735_v24 = vadd.f32 %v719_v14, %v702_v11  ;;  %v767_v25 = vadd.f32 %v751_v16, %v734_v36  ;;  %v3799_v29 = vmax.f32 %v3764_v41, %v883_v1  ;;  %v3801_v30 = vadd.f32 %v750_v28, %v733_v45 }
  0xc4   : > { %v736_v21 = vadd.f32 %v720_v49, %v703_v12  ;;  %v882_v33 = vsel %vm623_vm1, %v856_v57, %v857_v19  ;;  %v447_v39 = vpop.permute.xlu1 %446  ;;  %v3807_v42 = vsel %vm806_vm8, %v790_v60, %v822_v23  ;;  %v372_v28 = vadd.s32 64, %v3584_v20 }
  0xc5   : > { %v487_v40 = vpop.permute.xlu0 %486  ;;  %v768_v51 = vadd.f32 %v752_v2, %v735_v24  ;;  %v3809_v52 = vmax.f32 %v840_v55, %v882_v33  ;;  %1016 = vrot.lane.b32.xlu2 %v3799_v29, %s3426_s20  ;;  %v516_v36 = vrot.slane %v447_v39, 7  ;;  %v613_v45 = vrot.slane %v447_v39, 1 }
  0xc6   : > { %v524_v49 = vrot.slane %v487_v40, 7  ;;  %v621_v61 = vrot.slane %v487_v40, 1  ;;  %v3814_v6 = vand.u32 63, %v371_v4  ;;  %v3817_v57 = vmul.f32 %v3635_v46, %v767_v25 }
  0xc7   : > { %1018 = vrot.lane.b32.xlu1 %v3809_v52, %s3426_s20  ;;  %v535_v55 = vsel %vm526_vm0, %v516_v36, %v517_v15  ;;  %v536_v60 = vsel %vm526_vm0, %v515_v34, %v516_v36  ;;  %v713_v7 = vmul.f32 %v3596_v27, %v447_v39  ;;  %v785_v4 = vmul.f32 %v3635_v46, %v768_v51 }
  0xc8   : > { %v632_v9 = vsel %vm623_vm1, %v613_v45, %v614_v43  ;;  %v633_v11 = vsel %vm623_vm1, %v612_v35, %v613_v45  ;;  %v696_v12 = vmul.f32 %v3594_v26, %v536_v60  ;;  %v697_v14 = vmul.f32 %v3594_v26, %v535_v55 }
  0xc9   : > { %v745_v34 = vmul.f32 %v3619_v37, %v633_v11  ;;  %v527_v16 = vsel %vm526_vm0, %v524_v49, %v525_v13  ;;  %v721_v1 = vmul.f32 %v3596_v27, %v487_v40  ;;  %v746_v24 = vmul.f32 %v3619_v37, %v632_v9 }
  0xca   : > { %v729_v23 = vadd.f32 %v713_v7, %v696_v12  ;;  %v528_v31 = vsel %vm526_vm0, %v523_v48, %v524_v49  ;;  %v624_v35 = vsel %vm623_vm1, %v621_v61, %v622_v18  ;;  %v625_v25 = vsel %vm623_vm1, %v620_v10, %v621_v61 }
  0xcb   : > { %v761_v2 = vadd.f32 %v745_v34, %v3671_v5  ;;  %v704_v13 = vmul.f32 %v3594_v26, %v528_v31  ;;  %v705_v33 = vmul.f32 %v3594_v26, %v527_v16  ;;  %v753_v40 = vmul.f32 %v3619_v37, %v625_v25 }
  0xcc   : > { %v762_v39 = vadd.f32 %v746_v24, %v729_v23  ;;  %v754_v51 = vmul.f32 %v3619_v37, %v624_v35  ;;  %v854_v48 = vrot.slane %v3807_v42, 1  ;;  %v388_v5 = vand.u32 63, %v372_v28 }
  0xcd   : > { %v778_v8 = vmul.f32 %v3635_v46, %v761_v2  ;;  %v737_v36 = vadd.f32 %v721_v1, %v704_v13  ;;  %v738_v18 = vadd.f32 %v3714_v47, %v705_v33  ;;  %v457_v45 = vpop.permute.xlu0 %456  ;;  %v802_v10 = vadd.f32 %v3639_v50, %v785_v4 }
  0xce   : > { %v730_v49 = vadd.f32 %v3709_v44, %v697_v14  ;;  %v769_v61 = vadd.f32 %v753_v40, %v736_v21  ;;  %v884_v55 = vsel %vm623_vm1, %v854_v48, %v855_v58  ;;  %v779_v4 = vmul.f32 %v3635_v46, %v762_v39 }
  0xcf   : > { %v3873_v60 = vadd.f32 %v3639_v50, %v778_v8  ;;  %v770_v7 = vadd.f32 %v754_v51, %v737_v36  ;;  %v771_v47 = vadd.f32 %v3729_v0, %v738_v18  ;;  %v3877_v28 = vmax.f32 %v3807_v42, %v884_v55 }
  0xd0   : > { %v786_v44 = vmul.f32 %v3635_v46, %v769_v61  ;;  %vm3881_vm9 = vcmp.gt.s32.totalorder %v388_v5, 0  ;;  %v518_v21 = vrot.slane %v457_v45, 7  ;;  %vm598_vm10 = vcmp.lt.s32.totalorder %v3814_v6, 63 }
  0xd1   : > { %v787_v58 = vmul.f32 %v3635_v46, %v770_v7  ;;  %v788_v9 = vmul.f32 %v3635_v46, %v771_v47  ;;  %1014 = vrot.lane.b32.xlu1 %v3877_v28, %s3426_s20  ;;  %v615_v0 = vrot.slane %v457_v45, 1  ;;  %v3891_v11 = vmul.f32 0.01, %v3873_v60 }
  0xd2   : > { %v803_v12 = vadd.f32 %v3639_v50, %v786_v44  ;;  %v533_v14 = vsel %vm526_vm0, %v518_v21, %v519_v62  ;;  %v534_v34 = vsel %vm526_vm0, %v517_v15, %v518_v21  ;;  %v715_v24 = vmul.f32 %v3596_v27, %v457_v45 }
  0xd3   : > { %v3903_v16 = vadd.f32 %v3639_v50, %v788_v9  ;;  %v583_v1 = vsel %vm3881_vm9, %v534_v34, 0.0  ;;  %v630_v23 = vsel %vm623_vm1, %v615_v0, %v616_v63  ;;  %v3913_v62 = vadd.f32 %v3639_v50, %v787_v58 }
  0xd4   : > { %v631_v15 = vsel %vm623_vm1, %v614_v43, %v615_v0  ;;  %v698_v31 = vmul.f32 %v3594_v26, %v583_v1  ;;  %v699_v35 = vmul.f32 %v3594_v26, %v533_v14  ;;  %v835_v2 = vmul.f32 0.01, %v803_v12 }
  0xd5   : > { %v679_v54 = vsel %vm598_vm10, %v631_v15, 0.0  ;;  %v748_v63 = vmul.f32 %v3619_v37, %v630_v23  ;;  %v783_v27 = vmul.f32 %v3635_v46, %v3801_v30  ;;  %v801_v43 = vadd.f32 %v3639_v50, %v3817_v57 }
  0xd6   : > { %v731_v25 = vadd.f32 %v715_v24, %v698_v31  ;;  %v732_v13 = vadd.f32 %v3753_v22, %v699_v35  ;;  %v747_v3 = vmul.f32 %v3619_v37, %v679_v54  ;;  %vm818_vm11 = vcmp.ge.f32.partialorder %v802_v10, 0.0 }
  0xd7   : > { %v800_v33 = vadd.f32 %v3639_v50, %v783_v27  ;;  %v834_v26 = vmul.f32 0.01, %v802_v10  ;;  %v983_v39 = vrot.slane %v3799_v29, 1  ;;  %vm817_vm12 = vcmp.ge.f32.partialorder %v801_v43, 0.0 }
  0xd8   : > { %v763_v40 = vadd.f32 %v747_v3, %v730_v49  ;;  %v764_v51 = vadd.f32 %v748_v63, %v731_v25  ;;  %v765_v8 = vadd.f32 %v3760_v17, %v732_v13  ;;  %v833_v36 = vmul.f32 0.01, %v801_v43 }
  0xd9   : > { %vm816_vm13 = vcmp.ge.f32.partialorder %v800_v33, 0.0  ;;  %v832_v30 = vmul.f32 0.01, %v800_v33  ;;  %v850_v22 = vsel %vm818_vm11, %v802_v10, %v834_v26  ;;  %v984_v55 = vrot.slane %v3809_v52, 1 }
  0xda   : > { %v780_v37 = vmul.f32 %v3635_v46, %v763_v40  ;;  %v781_v18 = vmul.f32 %v3635_v46, %v764_v51  ;;  %v782_v57 = vmul.f32 %v3635_v46, %v765_v8  ;;  %v866_v5 = vrot.slane %v850_v22, 1 }
  0xdb   : > { %v848_v45 = vsel %vm816_vm13, %v800_v33, %v832_v30  ;;  %v849_v61 = vsel %vm817_vm12, %v801_v43, %v833_v36  ;;  %v858_v49 = vrot.slane %v3722_v59, 1  ;;  %v1011_v46 = vsel %vm623_vm1, %v983_v39, %v984_v55 }
  0xdc   : > { %v797_v17 = vadd.f32 %v3639_v50, %v780_v37  ;;  %v798_v7 = vadd.f32 %v3639_v50, %v781_v18  ;;  %v799_v47 = vadd.f32 %v3639_v50, %v782_v57  ;;  %v864_v10 = vrot.slane %v848_v45, 1  ;;  %1064 = vrot.lane.b32.xlu1 %v1011_v46, %s3427_s28 }
  0xdd   : > { %v865_v44 = vrot.slane %v849_v61, 1  ;;  %v881_v41 = vsel %vm623_vm1, %v857_v19, %v858_v49  ;;  %vm819_vm14 = vcmp.ge.f32.partialorder %v803_v12, 0.0  ;;  %v796_v21 = vadd.f32 %v3639_v50, %v779_v4 }
  0xde   : > { %v837_v58 = vmul.f32 0.01, %v3903_v16  ;;  %vm815_vm15 = vcmp.ge.f32.partialorder %v799_v47, 0.0  ;;  %v831_v9 = vmul.f32 0.01, %v799_v47  ;;  %v3959_v34 = vmax.f32 %v3772_v56, %v881_v41 }
  0xdf   : > { %v874_v0 = vsel %vm623_vm1, %v864_v10, %v865_v44  ;;  %v873_v14 = vsel %vm623_vm1, %v865_v44, %v866_v5  ;;  %v851_v19 = vsel %vm819_vm14, %v803_v12, %v835_v2  ;;  %v829_v24 = vmul.f32 0.01, %v797_v17 }
  0xe0   : > { %v3961_v1 = vsel %vm815_vm15, %v799_v47, %v831_v9  ;;  %v3963_v50 = vmax.f32 %v848_v45, %v874_v0  ;;  %v3965_v4 = vmax.f32 %v849_v61, %v873_v14  ;;  %v867_v23 = vrot.slane %v851_v19, 1 }
  0xe1   : > { %v863_v15 = vrot.slane %v3961_v1, 1  ;;  %v982_v31 = vrot.slane %v3877_v28, 1  ;;  %vm820_vm2 = vcmp.ge.f32.partialorder %v3913_v62, 0.0  ;;  %v836_v2 = vmul.f32 0.01, %v3913_v62 }
  0xe2   : > { %1034 = vrot.lane.b32.xlu2 %v3963_v50, %s3426_s20  ;;  %1036 = vrot.lane.b32.xlu0 %v3965_v4, %s3426_s20  ;;  %v992_v56 = vrot.slane %v3963_v50, 1  ;;  %v993_v12 = vrot.slane %v3965_v4, 1  ;;  %v872_v35 = vsel %vm623_vm1, %v866_v5, %v867_v23  ;;  %v985_v27 = vrot.slane %v3959_v34, 1 }
  0xe3   : > { %v875_v54 = vsel %vm623_vm1, %v863_v15, %v864_v10  ;;  %v3981_v63 = vmax.f32 %v850_v22, %v872_v35  ;;  %vm811_vm4 = vcmp.ge.f32.partialorder %v3873_v60, 0.0  ;;  %v852_v13 = vsel %vm820_vm2, %v3913_v62, %v836_v2 }
  0xe4   : > { %v1002_v25 = vsel %vm623_vm1, %v992_v56, %v993_v12  ;;  %v843_v3 = vsel %vm811_vm4, %v3873_v60, %v3891_v11  ;;  %vm812_vm5 = vcmp.ge.f32.partialorder %v796_v21, 0.0  ;;  %v868_v33 = vrot.slane %v852_v13, 1 }
  0xe5   : > { %v994_v43 = vrot.slane %v3981_v63, 1  ;;  %v859_v26 = vrot.slane %v843_v3, 1  ;;  %v828_v40 = vmul.f32 0.01, %v796_v21  ;;  %vm813_vm6 = vcmp.ge.f32.partialorder %v797_v17, 0.0 }
  0xe6   : > { %vm821_vm7 = vcmp.ge.f32.partialorder %v3903_v16, 0.0  ;;  %vm814_vm8 = vcmp.ge.f32.partialorder %v798_v7, 0.0  ;;  %v830_v51 = vmul.f32 0.01, %v798_v7  ;;  %v871_v62 = vsel %vm623_vm1, %v867_v23, %v868_v33 }
  0xe7   : > { %v1001_v8 = vsel %vm623_vm1, %v993_v12, %v994_v43  ;;  %v880_v60 = vsel %vm623_vm1, %v858_v49, %v859_v26  ;;  %v844_v11 = vsel %vm812_vm5, %v796_v21, %v828_v40  ;;  %v4001_v30 = vmax.f32 %v851_v19, %v871_v62 }
  0xe8   : > { %1084 = vrot.lane.b32.xlu1 %v1001_v8, %s3427_s28  ;;  %v4004_v36 = vmax.f32 %v3722_v59, %v880_v60  ;;  %v860_v22 = vrot.slane %v844_v11, 1  ;;  %v845_v37 = vsel %vm813_vm6, %v797_v17, %v829_v24  ;;  %v853_v57 = vsel %vm821_vm7, %v3903_v16, %v837_v58 }
  0xe9   : > { %v861_v18 = vrot.slane %v845_v37, 1  ;;  %v846_v5 = vsel %vm814_vm8, %v798_v7, %v830_v51  ;;  %v4008_v45 = vmax.f32 %v3961_v1, %v875_v54  ;;  %v1012_v59 = vsel %vm623_vm1, %v982_v31, %v983_v39 }
  0xea   : > { %1020 = vrot.lane.b32.xlu2 %v3959_v34, %s3426_s20  ;;  %1082 = vrot.lane.b32.xlu0 %v1002_v25, %s3427_s28  ;;  %v986_v61 = vrot.slane %v4004_v36, 1  ;;  %v879_v16 = vsel %vm623_vm1, %v859_v26, %v860_v22  ;;  %v869_v49 = vrot.slane %v853_v57, 1  ;;  %v862_v47 = vrot.slane %v846_v5, 1 }
  0xeb   : > { %v4022_v17 = vmax.f32 %v843_v3, %v879_v16  ;;  %v878_v7 = vsel %vm623_vm1, %v860_v22, %v861_v18  ;;  %v991_v10 = vrot.slane %v4008_v45, 1  ;;  %v1010_v44 = vsel %vm623_vm1, %v984_v55, %v985_v27 }
  0xec   : > { %v995_v39 = vrot.slane %v4001_v30, 1  ;;  %v4032_v46 = vmax.f32 %v844_v11, %v878_v7  ;;  %v870_v41 = vsel %vm623_vm1, %v868_v33, %v869_v49  ;;  %v885_v9 = vsel %vm623_vm1, %v869_v49, %v854_v48 }
  0xed   : > { %v987_v21 = vrot.slane %v4022_v17, 1  ;;  %v4037_v58 = vmax.f32 %v852_v13, %v870_v41  ;;  %v877_v0 = vsel %vm623_vm1, %v861_v18, %v862_v47  ;;  %v901_v14 = vmax.f32 %v853_v57, %v885_v9 }
  0xee   : > { %v988_v55 = vrot.slane %v4032_v46, 1  ;;  %v893_v19 = vmax.f32 %v845_v37, %v877_v0  ;;  %v876_v1 = vsel %vm623_vm1, %v862_v47, %v863_v15  ;;  %v1009_v23 = vsel %vm623_vm1, %v985_v27, %v986_v61 }
  0xef   : > { %v996_v42 = vrot.slane %v4037_v58, 1  ;;  %v4053_v24 = vmax.f32 %v846_v5, %v876_v1  ;;  %v4057_v48 = vsel %vm623_vm1, %v991_v10, %v992_v56  ;;  %v917_v12 = vsel %vm606_vm3, %v901_v14, 0.0 }
  0xf0   : > { %1038 = vrot.lane.b32.xlu1 %v3981_v63, %s3426_s20  ;;  %v1007_v15 = vsel %vm623_vm1, %v987_v21, %v988_v55  ;;  %v909_v35 = vsel %vm598_vm10, %v893_v19, 0.0  ;;  %v950_v2 = vrot.slane %v3877_v28, 7  ;;  %v965_v54 = vrot.slane %v917_v12, 7 }
  0xf1   : > { %v999_v56 = vsel %vm623_vm1, %v995_v39, %v996_v42  ;;  %v997_v27 = vrot.slane %v917_v12, 1  ;;  %v957_v25 = vrot.slane %v909_v35, 7  ;;  %v989_v13 = vrot.slane %v909_v35, 1 }
  0xf2   : > { %1066 = vrot.lane.b32.xlu2 %v1010_v44, %s3427_s28  ;;  %1062 = vrot.lane.b32.xlu0 %v1012_v59, %s3427_s28  ;;  %v990_v3 = vrot.slane %v4053_v24, 1  ;;  %v951_v33 = vrot.slane %v3799_v29, 7  ;;  %v959_v26 = vrot.slane %v4008_v45, 7  ;;  %v960_v8 = vrot.slane %v3963_v50, 7 }
  0xf3   : > { %v998_v40 = vsel %vm623_vm1, %v996_v42, %v997_v27  ;;  %v1013_v51 = vsel %vm623_vm1, %v997_v27, %v982_v31  ;;  %v952_v62 = vrot.slane %v3809_v52, 7  ;;  %v1006_v29 = vsel %vm623_vm1, %v988_v55, %v989_v13 }
  0xf4   : > { %v1005_v60 = vsel %vm623_vm1, %v989_v13, %v990_v3  ;;  %v1004_v11 = vsel %vm623_vm1, %v990_v3, %v991_v10  ;;  %v4095_v22 = vsel %vm526_vm0, %v950_v2, %v951_v33  ;;  %v4099_v28 = vsel %vm526_vm0, %v959_v26, %v960_v8 }
  0xf5   : > { %v953_v50 = vrot.slane %v3959_v34, 7  ;;  %v4104_v52 = vsel %vm526_vm0, %v951_v33, %v952_v62  ;;  %v4108_v31 = vsel %vm526_vm0, %v965_v54, %v950_v2  ;;  %v962_v37 = vrot.slane %v3981_v63, 7  ;;  %v3202_v63 = vld [vmem:[%s3544_s26 + $0x38] sm:$0xff] }
  0xf6   : > { %v963_v18 = vrot.slane %v4001_v30, 7  ;;  %v961_v57 = vrot.slane %v3965_v4, 7  ;;  %v955_v5 = vrot.slane %v4022_v17, 7  ;;  %v956_v34 = vrot.slane %v4032_v46, 7  ;;  %3249 = vmatpush.bf16.msra.mxu3 %v3202_v63  ;;  %1182 = vmatpush.bf16.msra.mxu0 %v3202_v63 }
  0xf7   : > { %v4116_v59 = vsel %vm526_vm0, %v952_v62, %v953_v50  ;;  %v954_v16 = vrot.slane %v4004_v36, 7  ;;  %v958_v49 = vrot.slane %v4053_v24, 7  ;;  %v964_v10 = vrot.slane %v4037_v58, 7 }
  0xf8   : > { %1024 = vrot.lane.b32.xlu1 %v4022_v17, %s3426_s20  ;;  %v4125_v7 = vsel %vm526_vm0, %v962_v37, %v963_v18  ;;  %v4129_v4 = vsel %vm526_vm0, %v960_v8, %v961_v57  ;;  %v4133_v47 = vsel %vm526_vm0, %v961_v57, %v962_v37  ;;  %v4138_v44 = vsel %vm526_vm0, %v955_v5, %v956_v34  ;;  %v3197_v17 = vld [vmem:[%s3544_s26 + $0x10] sm:$0xff] }
  0xf9   : > { %v4142_v41 = vsel %vm526_vm0, %v954_v16, %v955_v5  ;;  %v4146_v9 = vsel %vm526_vm0, %v953_v50, %v954_v16  ;;  %v4150_v0 = vsel %vm526_vm0, %v957_v25, %v958_v49  ;;  %v4157_v55 = vsel %vm526_vm0, %v964_v10, %v965_v54 }
  0xfa   : > { %1040 = vrot.lane.b32.xlu2 %v4001_v30, %s3426_s20  ;;  %1068 = vrot.lane.b32.xlu0 %v1009_v23, %s3427_s28  ;;  %v4161_v14 = vsel %vm526_vm0, %v963_v18, %v964_v10  ;;  %v4165_v19 = vsel %vm526_vm0, %v956_v34, %v957_v25  ;;  %v4169_v1 = vsel %vm526_vm0, %v958_v49, %v959_v26  ;;  %v3200_v30 = vld [vmem:[%s3544_s26 + $0x28] sm:$0xff] }
  0xfb   : > { %v1008_v23 = vsel %vm623_vm1, %v986_v61, %v987_v21  ;;  %v1000_v42 = vsel %vm623_vm1, %v994_v43, %v995_v39  ;;  %v3201_v43 = vld [vmem:[%s3544_s26 + $0x30] sm:$0xff]  ;;  %v3198_v61 = vld [vmem:[%s3544_s26 + $0x18] sm:$0xff]  ;;  %v3196_v21 = vld [vmem:[%s3544_s26 + $0x8] sm:$0xff] }
  0xfc   : > { %3250 = vmatpush.bf16.msra.mxu3 %v3201_v43  ;;  %1183 = vmatpush.bf16.msra.mxu0 %v3201_v43 }
 0x100   : > { %1070 = vrot.lane.b32.xlu1 %v1008_v23, %s3427_s28  ;;  %3251 = vmatpush.bf16.msra.mxu3 %v3200_v30 }
 0x101   : > { %1184 = vmatpush.bf16.msra.mxu0 %v3200_v30 }
 0x102   : > { %1086 = vrot.lane.b32.xlu2 %v1000_v42, %s3427_s28  ;;  %1022 = vrot.lane.b32.xlu0 %v4004_v36, %s3426_s20  ;;  %v3199_v36 = vld [vmem:[%s3544_s26 + $0x20] sm:$0xff] }
 0x104   : > { %3252 = vmatpush.bf16.msra.mxu3 %v3199_v36 }
 0x105   : > { %1185 = vmatpush.bf16.msra.mxu0 %v3199_v36 }
 0x108   : > { %1044 = vrot.lane.b32.xlu1 %v917_v12, %s3426_s20  ;;  %3253 = vmatpush.bf16.msra.mxu3 %v3198_v61 }
 0x109   : > { %1186 = vmatpush.bf16.msra.mxu0 %v3198_v61 }
 0x10a   : > { %1072 = vrot.lane.b32.xlu2 %v1007_v15, %s3427_s28  ;;  %1088 = vrot.lane.b32.xlu0 %v999_v56, %s3427_s28 }
 0x10c   : > { %3254 = vmatpush.bf16.msra.mxu3 %v3197_v17 }
 0x10d   : > { %1187 = vmatpush.bf16.msra.mxu0 %v3197_v17 }
 0x110   : > { %1090 = vrot.lane.b32.xlu1 %v998_v40, %s3427_s28  ;;  %3255 = vmatpush.bf16.msra.mxu3 %v3196_v21 }
 0x111   : > { %1188 = vmatpush.bf16.msra.mxu0 %v3196_v21 }
 0x112   : > { %1026 = vrot.lane.b32.xlu2 %v4032_v46, %s3426_s20  ;;  %1042 = vrot.lane.b32.xlu0 %v4037_v58, %s3426_s20 }
 0x118   : > { %1076 = vrot.lane.b32.xlu1 %v1005_v60, %s3427_s28 }
 0x11a   : > { %1092 = vrot.lane.b32.xlu2 %v1013_v51, %s3427_s28  ;;  %1028 = vrot.lane.b32.xlu0 %v909_v35, %s3426_s20 }
 0x11f   : > { %v1017_v39 = vpop.permute.xlu2 %1016 }
 0x120   : > { %1078 = vrot.lane.b32.xlu1 %v1004_v11, %s3427_s28  ;;  %v1047_v40 = vadd.f32 %v1017_v39, %v4095_v22 }
 0x122   : > { %1030 = vrot.lane.b32.xlu2 %v4053_v24, %s3426_s20  ;;  %1074 = vrot.lane.b32.xlu0 %v1006_v29, %s3427_s28 }
 0x12a   : > { %1080 = vrot.lane.b32.xlu2 %v4057_v48, %s3427_s28  ;;  %1032 = vrot.lane.b32.xlu0 %v4008_v45, %s3426_s20  ;;  %v3195_v45 = vld [vmem:[%s3544_s26] sm:$0xff] }
 0x12b   : > { %3256 = vmatpush.bf16.msra.mxu3 %v3195_v45  ;;  %1189 = vmatpush.bf16.msra.mxu0 %v3195_v45 }
 0x139   : > { %v1019_v46 = vpop.permute.xlu1 %1018 }
 0x13a   : > { %v1048_v37 = vadd.f32 %v1019_v46, %v4104_v52 }
 0x13c   : > { %v1035_v58 = vpop.permute.xlu2 %1034 }
 0x13d   : > { %v1056_v54 = vadd.f32 %v1035_v58, %v4099_v28 }
 0x143   : > { %v1015_v24 = vpop.permute.xlu1 %1014 }
 0x144   : > { %v1021_v48 = vpop.permute.xlu2 %1020  ;;  %v1046_v51 = vadd.f32 %v1015_v24, %v4108_v31 }
 0x145   : > { %v1049_v28 = vadd.f32 %v1021_v48, %v4116_v59 }
 0x14c   : > { %v1067_v12 = vpop.permute.xlu2 %1066 }
 0x14d   : > { %v1096_v57 = vadd.f32 %v1067_v12, %v1048_v37 }
 0x14e   : > { %v1065_v15 = vpop.permute.xlu1 %1064 }
 0x14f   : > { %v1095_v62 = vadd.f32 %v1065_v15, %v1047_v40  ;;  %v4234_v40 = vperm.slane %v3622_v38, 1 }
 0x154   : > { %v1037_v35 = vpop.permute.xlu0 %1036  ;;  %v1041_v3 = vpop.permute.xlu2 %1040 }
 0x155   : > { %v1057_v2 = vadd.f32 %v1037_v35, %v4129_v4  ;;  %v1059_v52 = vadd.f32 %v1041_v3, %v4125_v7 }
 0x15a   : > { %v1085_v56 = vpop.permute.xlu1 %1084 }
 0x15b   : > { %v1105_v27 = vadd.f32 %v1085_v56, %v1057_v2 }
 0x15c   : > { %v1083_v25 = vpop.permute.xlu0 %1082  ;;  %v1087_v11 = vpop.permute.xlu2 %1086 }
 0x15d   : > { %v1104_v13 = vadd.f32 %v1083_v25, %v1056_v54 }
 0x15f   : > { %v1131_v33 = vpack.c.bf16 %v1105_v27, %v1104_v13 }
 0x161   : > { %1215 = vmatmul.bf16.vlgmr.msra.gmra.mxu3 %v1131_v33 }
 0x162   : > { %v1039_v26 = vpop.permute.xlu1 %1038 }
 0x163   : > { %v1058_v42 = vadd.f32 %v1039_v26, %v4133_v47  ;;  %v4231_v26 = vperm.slane %v3613_v32, 1 }
 0x164   : > { %v1063_v8 = vpop.permute.xlu0 %1062  ;;  %v1073_v16 = vpop.permute.xlu2 %1072 }
 0x165   : > { %v1094_v60 = vadd.f32 %v1063_v8, %v1046_v51  ;;  %v1106_v36 = vadd.f32 %v1087_v11, %v1058_v42 }
 0x167   : > { %v1126_v29 = vpack.c.bf16 %v1095_v62, %v1094_v60 }
 0x169   : > { %1190 = vmatmul.bf16.vlgmr.msra.gmra.mxu0 %v1126_v29 }
 0x16a   : > { %v1025_v50 = vpop.permute.xlu1 %1024 }
 0x16b   : > { %v1051_v22 = vadd.f32 %v1025_v50, %v4142_v41 }
 0x16c   : > { %v1069_v18 = vpop.permute.xlu0 %1068  ;;  %v1027_v43 = vpop.permute.xlu2 %1026 }
 0x16d   : > { %v1097_v5 = vadd.f32 %v1069_v18, %v1049_v28  ;;  %v1099_v10 = vadd.f32 %v1073_v16, %v1051_v22  ;;  %v1052_v15 = vadd.f32 %v1027_v43, %v4138_v44 }
 0x16f   : > { %v1127_v34 = vpack.c.bf16 %v1097_v5, %v1096_v57 }
 0x172   : > { %v1071_v49 = vpop.permute.xlu1 %1070 }
 0x174   : > { %v1023_v31 = vpop.permute.xlu0 %1022  ;;  %v1093_v21 = vpop.permute.xlu2 %1092 }
 0x175   : > { %v1050_v4 = vadd.f32 %v1023_v31, %v4146_v9 }
 0x177   : > { %v1098_v23 = vadd.f32 %v1071_v49, %v1050_v4 }
 0x179   : > { %1195 = vmatmul.bf16.gmra.mxu0 %v1127_v34  ;;  %v1128_v63 = vpack.c.bf16 %v1099_v10, %v1098_v23 }
 0x17a   : > { %v1045_v59 = vpop.permute.xlu1 %1044 }
 0x17b   : > { %v1061_v41 = vadd.f32 %v1045_v59, %v4157_v55 }
 0x17c   : > { %v1089_v30 = vpop.permute.xlu0 %1088  ;;  %v1031_v12 = vpop.permute.xlu2 %1030 }
 0x17d   : > { %v1107_v61 = vadd.f32 %v1089_v30, %v1059_v52  ;;  %v1109_v45 = vadd.f32 %v1093_v21, %v1061_v41  ;;  %v1054_v27 = vadd.f32 %v1031_v12, %v4150_v0 }
 0x17f   : > { %v1132_v17 = vpack.c.bf16 %v1107_v61, %v1106_v36 }
 0x181   : > { %1220 = vmatmul.bf16.gmra.mxu3 %v1132_v17 }
 0x182   : > { %v1091_v46 = vpop.permute.xlu1 %1090 }
 0x184   : > { %v1043_v39 = vpop.permute.xlu0 %1042  ;;  %v1081_v13 = vpop.permute.xlu2 %1080 }
 0x185   : > { %v1060_v9 = vadd.f32 %v1043_v39, %v4161_v14 }
 0x187   : > { %v1108_v47 = vadd.f32 %v1091_v46, %v1060_v9 }
 0x189   : > { %1200 = vmatmul.bf16.gmra.mxu0 %v1128_v63  ;;  %v1133_v58 = vpack.c.bf16 %v1109_v45, %v1108_v47 }
 0x18a   : > { %v1077_v48 = vpop.permute.xlu1 %1076 }
 0x18c   : > { %v1029_v24 = vpop.permute.xlu0 %1028 }
 0x18d   : > { %v1053_v7 = vadd.f32 %v1029_v24, %v4165_v19 }
 0x18f   : > { %v1101_v2 = vadd.f32 %v1077_v48, %v1053_v7 }
 0x191   : > { %1225 = vmatmul.bf16.gmra.mxu3 %v1133_v58 }
 0x192   : > { %v1079_v54 = vpop.permute.xlu1 %1078 }
 0x193   : > { %v1102_v3 = vadd.f32 %v1079_v54, %v1054_v27 }
 0x194   : > { %v1075_v35 = vpop.permute.xlu0 %1074 }
 0x195   : > { %v1100_v55 = vadd.f32 %v1075_v35, %v1052_v15 }
 0x197   : > { %v1129_v56 = vpack.c.bf16 %v1101_v2, %v1100_v55 }
 0x199   : > { %1205 = vmatmul.bf16.gmra.mxu0 %v1129_v56 }
 0x19c   : > { %v1033_v14 = vpop.permute.xlu0 %1032 }
 0x19d   : > { %v1055_v25 = vadd.f32 %v1033_v14, %v4169_v1 }
 0x19f   : > { %v1103_v33 = vadd.f32 %v1081_v13, %v1055_v25 }
 0x1a1   : > { %v1130_v19 = vpack.c.bf16 %v1103_v33, %v1102_v3 }
 0x1a9   : > { %1210 = vmatmul.bf16.gmra.mxu0 %v1130_v19 }
 0x1e4   : > { %v1216_v44 = vpop.f32.mrf.mxu3 }
 0x1e5   : > { %v1242_v51 = vmul.f32 %v4231_v26, %v1216_v44 }
 0x1e6   : > { %v1191_v8 = vpop.f32.mrf.mxu0 }
 0x1e7   : > { %v1259_v62 = vadd.f32 %v4234_v40, %v1242_v51  ;;  %v1232_v29 = vmul.f32 %v4231_v26, %v1191_v8 }
 0x1e9   : > { %v1291_v60 = vmul.f32 0.01, %v1259_v62  ;;  %vm1275_vm3 = vcmp.ge.f32.partialorder %v1259_v62, 0.0  ;;  %v1249_v18 = vadd.f32 %v4234_v40, %v1232_v29 }
 0x1eb   : > { %v4243_v37 = vsel %vm1275_vm3, %v1259_v62, %v1291_v60  ;;  %v1281_v49 = vmul.f32 0.01, %v1249_v18  ;;  %vm1265_vm11 = vcmp.ge.f32.partialorder %v1249_v18, 0.0  ;;  %vm1376_vm3 = vcmp.lt.s32.totalorder %v3643_v53, 62 }
 0x1ec   : > { %v1218_v0 = vpop.f32.mrf.mxu3  ;;  %v1323_v16 = vrot.slane %v4243_v37, 1 }
 0x1ed   : > { %v1243_v1 = vmul.f32 %v4231_v26, %v1218_v0  ;;  %v4258_v63 = vsel %vm1265_vm11, %v1249_v18, %v1281_v49 }
 0x1ee   : > { %v1193_v11 = vpop.f32.mrf.mxu0  ;;  %v1313_v30 = vrot.slane %v4258_v63, 1 }
 0x1ef   : > { %v1260_v32 = vadd.f32 %v4234_v40, %v1243_v1  ;;  %v1233_v50 = vmul.f32 %v4231_v26, %v1193_v11 }
 0x1f1   : > { %vm1276_vm9 = vcmp.ge.f32.partialorder %v1260_v32, 0.0  ;;  %v1292_v38 = vmul.f32 0.01, %v1260_v32  ;;  %v1250_v28 = vadd.f32 %v4234_v40, %v1233_v50 }
 0x1f3   : > { %v1308_v57 = vsel %vm1276_vm9, %v1260_v32, %v1292_v38  ;;  %v1282_v34 = vmul.f32 0.01, %v1250_v28  ;;  %vm1266_vm10 = vcmp.ge.f32.partialorder %v1250_v28, 0.0 }
 0x1f4   : > { %v1324_v5 = vrot.slane %v1308_v57, 1 }
 0x1f5   : > { %v1298_v23 = vsel %vm1266_vm10, %v1250_v28, %v1282_v34  ;;  %vm1368_vm10 = vcmp.lt.s32.totalorder %v3814_v6, 62 }
 0x1f6   : > { %v1196_v22 = vpop.f32.mrf.mxu0  ;;  %v1333_v31 = vsel %vm623_vm1, %v1323_v16, %v1324_v5  ;;  %v1314_v59 = vrot.slane %v1298_v23, 1 }
 0x1f7   : > { %v1234_v4 = vmul.f32 %v4231_v26, %v1196_v22  ;;  %v4253_v10 = vmax.f32 %v4243_v37, %v1333_v31 }
 0x1f8   : > { %v1343_v41 = vsel %vm623_vm1, %v1313_v30, %v1314_v59 }
 0x1f9   : > { %v1251_v42 = vadd.f32 %v4234_v40, %v1234_v4  ;;  %1541 = vrot.lane.b32.xlu0 %v4253_v10, %s3427_s28  ;;  %v4268_v46 = vmax.f32 %v4258_v63, %v1343_v41  ;;  %v1467_v49 = vrot.slane %v4253_v10, 7 }
 0x1fb   : > { %vm1267_vm12 = vcmp.ge.f32.partialorder %v1251_v42, 0.0  ;;  %v1283_v52 = vmul.f32 0.01, %v1251_v42  ;;  %v1489_v7 = vrot.slane %v4268_v46, 1  ;;  %v1457_v12 = vrot.slane %v4268_v46, 7 }
 0x1fd   : > { %v1299_v43 = vsel %vm1267_vm12, %v1251_v42, %v1283_v52 }
 0x1fe   : > { %v1198_v36 = vpop.f32.mrf.mxu0  ;;  %v1315_v61 = vrot.slane %v1299_v43, 1 }
 0x1ff   : > { %v1235_v17 = vmul.f32 %v4231_v26, %v1198_v36 }
 0x200   : > { %v1342_v9 = vsel %vm623_vm1, %v1314_v59, %v1315_v61 }
 0x201   : > { %v1252_v39 = vadd.f32 %v4234_v40, %v1235_v17  ;;  %v4272_v47 = vmax.f32 %v1298_v23, %v1342_v9  ;;  %v1499_v17 = vrot.slane %v4253_v10, 1  ;;  %v3207_v10 = vld [vmem:[%s3544_s26 + $0xe0] sm:$0xff] }
 0x203   : > { %v1284_v21 = vmul.f32 0.01, %v1252_v39  ;;  %vm1268_vm13 = vcmp.ge.f32.partialorder %v1252_v39, 0.0  ;;  %v1490_v48 = vrot.slane %v4272_v47, 1  ;;  %v1458_v15 = vrot.slane %v4272_v47, 7 }
 0x204   : > { %v1221_v45 = vpop.f32.mrf.mxu3 }
 0x205   : > { %v1244_v58 = vmul.f32 %v4231_v26, %v1221_v45  ;;  %v1300_v55 = vsel %vm1268_vm13, %v1252_v39, %v1284_v21  ;;  %v4285_v56 = vsel %vm526_vm0, %v1457_v12, %v1458_v15  ;;  %v4291_v54 = vsel %vm623_vm1, %v1489_v7, %v1490_v48 }
 0x206   : > { %v1201_v24 = vpop.f32.mrf.mxu0  ;;  %v1316_v25 = vrot.slane %v1300_v55, 1 }
 0x207   : > { %v1261_v35 = vadd.f32 %v4234_v40, %v1244_v58  ;;  %v1236_v2 = vmul.f32 %v4231_v26, %v1201_v24 }
 0x208   : > { %v1341_v33 = vsel %vm623_vm1, %v1315_v61, %v1316_v25 }
 0x209   : > { %vm1277_vm14 = vcmp.ge.f32.partialorder %v1261_v35, 0.0  ;;  %v1293_v14 = vmul.f32 0.01, %v1261_v35  ;;  %v1253_v27 = vadd.f32 %v4234_v40, %v1236_v2  ;;  %v4296_v51 = vmax.f32 %v1299_v43, %v1341_v33 }
 0x20b   : > { %v1309_v13 = vsel %vm1277_vm14, %v1261_v35, %v1293_v14  ;;  %vm1269_vm15 = vcmp.ge.f32.partialorder %v1253_v27, 0.0  ;;  %v1285_v3 = vmul.f32 0.01, %v1253_v27  ;;  %v1491_v29 = vrot.slane %v4296_v51, 1 }
 0x20c   : > { %v1325_v19 = vrot.slane %v1309_v13, 1  ;;  %v1223_v44 = vpop.f32.mrf.mxu3  ;;  %v1459_v38 = vrot.slane %v4296_v51, 7 }
 0x20d   : > { %v1301_v8 = vsel %vm1269_vm15, %v1253_v27, %v1285_v3  ;;  %v1245_v62 = vmul.f32 %v4231_v26, %v1223_v44  ;;  %v4307_v28 = vsel %vm623_vm1, %v1490_v48, %v1491_v29 }
 0x20e   : > { %v1317_v0 = vrot.slane %v1301_v8, 1  ;;  %v1203_v60 = vpop.f32.mrf.mxu0  ;;  %v1332_v1 = vsel %vm623_vm1, %v1324_v5, %v1325_v19  ;;  %v4313_v5 = vsel %vm526_vm0, %v1458_v15, %v1459_v38 }
 0x20f   : > { %v1262_v11 = vadd.f32 %v4234_v40, %v1245_v62  ;;  %v1237_v32 = vmul.f32 %v4231_v26, %v1203_v60  ;;  %v1356_v50 = vmax.f32 %v1308_v57, %v1332_v1  ;;  %v1603_v57 = vpack.c.bf16 %v4307_v28, %v4291_v54 }
 0x210   : > { %v1340_v4 = vsel %vm623_vm1, %v1316_v25, %v1317_v0 }
 0x211   : > { %vm1278_vm2 = vcmp.ge.f32.partialorder %v1262_v11, 0.0  ;;  %v1294_v18 = vmul.f32 0.01, %v1262_v11  ;;  %v1254_v34 = vadd.f32 %v4234_v40, %v1237_v32  ;;  %1543 = vrot.lane.b32.xlu1 %v1356_v50, %s3427_s28  ;;  %v4320_v59 = vmax.f32 %v1300_v55, %v1340_v4 }
 0x212   : > { %v1468_v52 = vrot.slane %v1356_v50, 7  ;;  %v1500_v43 = vrot.slane %v1356_v50, 1 }
 0x213   : > { %v1310_v22 = vsel %vm1278_vm2, %v1262_v11, %v1294_v18  ;;  %vm1270_vm4 = vcmp.ge.f32.partialorder %v1254_v34, 0.0  ;;  %v1286_v31 = vmul.f32 0.01, %v1254_v34  ;;  %v1460_v45 = vrot.slane %v4320_v59, 7 }
 0x214   : > { %v1326_v23 = vrot.slane %v1310_v22, 1  ;;  %v1226_v42 = vpop.f32.mrf.mxu3  ;;  %v4330_v21 = vsel %vm526_vm0, %v1467_v49, %v1468_v52  ;;  %v1492_v15 = vrot.slane %v4320_v59, 1  ;;  %v4348_v55 = vsel %vm623_vm1, %v1499_v17, %v1500_v43 }
 0x215   : > { %v1302_v36 = vsel %vm1270_vm4, %v1254_v34, %v1286_v31  ;;  %v1246_v61 = vmul.f32 %v4231_v26, %v1226_v42  ;;  %v4342_v2 = vsel %vm526_vm0, %v1459_v38, %v1460_v45 }
 0x216   : > { %v1318_v41 = vrot.slane %v1302_v36, 1  ;;  %v1206_v39 = vpop.f32.mrf.mxu0  ;;  %v1331_v9 = vsel %vm623_vm1, %v1325_v19, %v1326_v23 }
 0x217   : > { %v1263_v58 = vadd.f32 %v4234_v40, %v1246_v61  ;;  %v1238_v24 = vmul.f32 %v4231_v26, %v1206_v39  ;;  %v4335_v48 = vmax.f32 %v1309_v13, %v1331_v9  ;;  %v4357_v13 = vsel %vm623_vm1, %v1491_v29, %v1492_v15  ;;  %v3210_v39 = vld [vmem:[%s3544_s26 + $0xf8] sm:$0xff] }
 0x218   : > { %v1339_v35 = vsel %vm623_vm1, %v1317_v0, %v1318_v41  ;;  %3257 = vmatpush.bf16.msra.mxu2 %v3210_v39  ;;  %1714 = vmatpush.bf16.msra.mxu1 %v3210_v39 }
 0x219   : > { %vm1279_vm5 = vcmp.ge.f32.partialorder %v1263_v58, 0.0  ;;  %v1295_v14 = vmul.f32 0.01, %v1263_v58  ;;  %v1255_v27 = vadd.f32 %v4234_v40, %v1238_v24  ;;  %1545 = vrot.lane.b32.xlu2 %v4335_v48, %s3427_s28  ;;  %v4353_v25 = vmax.f32 %v1301_v8, %v1339_v35 }
 0x21a   : > { %v1469_v62 = vrot.slane %v4335_v48, 7  ;;  %v1501_v0 = vrot.slane %v4335_v48, 1 }
 0x21b   : > { %v1311_v3 = vsel %vm1279_vm5, %v1263_v58, %v1295_v14  ;;  %vm1271_vm6 = vcmp.ge.f32.partialorder %v1255_v27, 0.0  ;;  %v1287_v33 = vmul.f32 0.01, %v1255_v27  ;;  %v1461_v50 = vrot.slane %v4353_v25, 7 }
 0x21c   : > { %v1327_v19 = vrot.slane %v1311_v3, 1  ;;  %v1228_v44 = vpop.f32.mrf.mxu3  ;;  %v4366_v29 = vsel %vm526_vm0, %v1468_v52, %v1469_v62  ;;  %v1493_v31 = vrot.slane %v4353_v25, 1  ;;  %v4380_v42 = vsel %vm623_vm1, %v1500_v43, %v1501_v0 }
 0x21d   : > { %v1247_v60 = vmul.f32 %v4231_v26, %v1228_v44  ;;  %v1303_v1 = vsel %vm1271_vm6, %v1255_v27, %v1287_v33  ;;  %v1613_v9 = vpack.c.bf16 %v4380_v42, %v4348_v55 }
 0x21e   : > { %v1208_v11 = vpop.f32.mrf.mxu0  ;;  %v1330_v8 = vsel %vm623_vm1, %v1326_v23, %v1327_v19  ;;  %v1319_v32 = vrot.slane %v1303_v1, 1  ;;  %v4376_v23 = vsel %vm526_vm0, %v1460_v45, %v1461_v50 }
 0x21f   : > { %v1264_v38 = vadd.f32 %v4234_v40, %v1247_v60  ;;  %v1239_v18 = vmul.f32 %v4231_v26, %v1208_v11  ;;  %v1358_v34 = vmax.f32 %v1310_v22, %v1330_v8 }
 0x220   : > { %v1338_v4 = vsel %vm623_vm1, %v1318_v41, %v1319_v32  ;;  %v4389_v41 = vsel %vm623_vm1, %v1492_v15, %v1493_v31 }
 0x221   : > { %vm1280_vm7 = vcmp.ge.f32.partialorder %v1264_v38, 0.0  ;;  %v1296_v52 = vmul.f32 0.01, %v1264_v38  ;;  %v1256_v61 = vadd.f32 %v4234_v40, %v1239_v18  ;;  %1547 = vrot.lane.b32.xlu0 %v1358_v34, %s3427_s28  ;;  %v4384_v22 = vmax.f32 %v1302_v36, %v1338_v4 }
 0x222   : > { %v1605_v58 = vpack.c.bf16 %v4389_v41, %v4357_v13  ;;  %v1470_v48 = vrot.slane %v1358_v34, 7  ;;  %v1502_v36 = vrot.slane %v1358_v34, 1  ;;  %v3234_v41 = vld [vmem:[%s3544_s26 + $0x1f8] sm:$0xff] }
 0x223   : > { %v1312_v45 = vsel %vm1280_vm7, %v1264_v38, %v1296_v52  ;;  %vm1272_vm8 = vcmp.ge.f32.partialorder %v1256_v61, 0.0  ;;  %v1288_v43 = vmul.f32 0.01, %v1256_v61  ;;  %v1462_v38 = vrot.slane %v4384_v22, 7  ;;  %2368 = vmatpush.bf16.msrb.mxu0 %v3234_v41 }
 0x224   : > { %v1328_v24 = vrot.slane %v1312_v45, 1  ;;  %v4404_v44 = vsel %vm526_vm0, %v1469_v62, %v1470_v48  ;;  %v4413_v63 = vsel %vm623_vm1, %v1501_v0, %v1502_v36 }
 0x225   : > { %v1304_v35 = vsel %vm1272_vm8, %v1256_v61, %v1288_v43  ;;  %v4423_v62 = vsel %vm526_vm0, %v1461_v50, %v1462_v38  ;;  %vm1949_vm8 = vcmp.lt.s32.totalorder %v3814_v6, 61 }
 0x226   : > { %v1320_v14 = vrot.slane %v1304_v35, 1  ;;  %v1211_v15 = vpop.f32.mrf.mxu0  ;;  %v1329_v27 = vsel %vm623_vm1, %v1327_v19, %v1328_v24  ;;  %v1344_v33 = vsel %vm623_vm1, %v1328_v24, %v1313_v30  ;;  %v1494_v19 = vrot.slane %v4384_v22, 1 }
 0x227   : > { %v1240_v60 = vmul.f32 %v4231_v26, %v1211_v15  ;;  %v1359_v11 = vmax.f32 %v1311_v3, %v1329_v27  ;;  %v1360_v8 = vmax.f32 %v1312_v45, %v1344_v33 }
 0x228   : > { %v1337_v18 = vsel %vm623_vm1, %v1319_v32, %v1320_v14  ;;  %v4428_v0 = vsel %vm623_vm1, %v1493_v31, %v1494_v19 }
 0x229   : > { %v1257_v30 = vadd.f32 %v4234_v40, %v1240_v60  ;;  %1549 = vrot.lane.b32.xlu1 %v1359_v11, %s3427_s28  ;;  %1521 = vrot.lane.b32.xlu0 %v4268_v46, %s3427_s28  ;;  %v1424_v3 = vsel %vm1376_vm3, %v1360_v8, 0.0  ;;  %v1351_v32 = vmax.f32 %v1303_v1, %v1337_v18  ;;  %v1471_v52 = vrot.slane %v1359_v11, 7 }
 0x22a   : > { %1551 = vrot.lane.b32.xlu2 %v1424_v3, %s3427_s28  ;;  %v1472_v4 = vrot.slane %v1424_v3, 7  ;;  %v1503_v61 = vrot.slane %v1359_v11, 1  ;;  %v1504_v45 = vrot.slane %v1424_v3, 1  ;;  %vm3428_vm3 = vmmov 1  }
 0x22b   : > { %vm1273_vm9 = vcmp.ge.f32.partialorder %v1257_v30, 0.0  ;;  %v1289_v34 = vmul.f32 0.01, %v1257_v30  ;;  %v4433_v50 = vsel %vm526_vm0, %v1470_v48, %v1471_v52  ;;  %v1463_v1 = vrot.slane %v1351_v32, 7 }
 0x22c   : > { %v1495_v15 = vrot.slane %v1351_v32, 1  ;;  %v4438_v27 = vsel %vm526_vm0, %v1471_v52, %v1472_v4  ;;  %v4444_v33 = vsel %vm526_vm0, %v1472_v4, %v1457_v12  ;;  %v4448_v60 = vsel %vm623_vm1, %v1502_v36, %v1503_v61 }
 0x22d   : > { %v1305_v39 = vsel %vm1273_vm9, %v1257_v30, %v1289_v34  ;;  %v1615_v8 = vpack.c.bf16 %v4448_v60, %v4413_v63  ;;  %v3242_v63 = vld [vmem:[%s3544_s26 + $0x238] sm:$0xff]  ;;  %vm3243_vm9 = vmpackc.low %vm1949_vm8, %vm3428_vm3 }
 0x22e   : > { %v1321_v43 = vrot.slane %v1305_v39, 1  ;;  %v1213_v24 = vpop.f32.mrf.mxu0  ;;  %v4458_v11 = vsel %vm623_vm1, %v1494_v19, %v1495_v15 }
 0x22f   : > { %v1241_v31 = vmul.f32 %v4231_v26, %v1213_v24  ;;  %v4454_v26 = vsel %vm526_vm0, %v1462_v38, %v1463_v1  ;;  %v4473_v38 = vsel %vm623_vm1, %v1503_v61, %v1504_v45 }
 0x230   : > { %v1336_v48 = vsel %vm623_vm1, %v1320_v14, %v1321_v43  ;;  %v1607_v14 = vpack.c.bf16 %v4458_v11, %v4428_v0  ;;  %v3230_v11 = vld [vmem:[%s3544_s26 + $0x1d8] sm:$0xff] }
 0x231   : > { %v1258_v12 = vadd.f32 %v4234_v40, %v1241_v31  ;;  %1523 = vrot.lane.b32.xlu1 %v4272_v47, %s3427_s28  ;;  %1527 = vrot.lane.b32.xlu0 %v4320_v59, %s3427_s28  ;;  %v1352_v36 = vmax.f32 %v1304_v35, %v1336_v48  ;;  %v4479_v40 = vsel %vm623_vm1, %v1504_v45, %v1489_v7  ;;  %v3208_v31 = vld [vmem:[%s3544_s26 + $0xe8] sm:$0xff]  ;;  %v3205_v48 = vld [vmem:[%s3544_s26 + $0xd0] sm:$0xff] }
 0x232   : > { %1525 = vrot.lane.b32.xlu2 %v4296_v51, %s3427_s28  ;;  %v1617_v35 = vpack.c.bf16 %v4479_v40, %v4473_v38 }
 0x233   : > { %vm1274_vm11 = vcmp.ge.f32.partialorder %v1258_v12, 0.0  ;;  %v1290_v47 = vmul.f32 0.01, %v1258_v12  ;;  %v1416_v59 = vsel %vm1368_vm10, %v1352_v36, 0.0  ;;  %v3203_v36 = vld [vmem:[%s3544_s26 + $0xc0] sm:$0xff] }
 0x234   : > { %v1464_v18 = vrot.slane %v1416_v59, 7  ;;  %v1496_v19 = vrot.slane %v1416_v59, 1 }
 0x235   : > { %v1306_v51 = vsel %vm1274_vm11, %v1258_v12, %v1290_v47  ;;  %v3204_v12 = vld [vmem:[%s3544_s26 + $0xc8] sm:$0xff]  ;;  %v3218_v47 = vld [vmem:[%s3544_s26 + $0x138] sm:$0xff] }
 0x236   : > { %v1322_v30 = vrot.slane %v1306_v51, 1  ;;  %v4496_v3 = vsel %vm526_vm0, %v1463_v1, %v1464_v18 }
 0x238   : > { %v1334_v46 = vsel %vm623_vm1, %v1322_v30, %v1323_v16  ;;  %v1335_v7 = vsel %vm623_vm1, %v1321_v43, %v1322_v30  ;;  %v4502_v16 = vsel %vm623_vm1, %v1495_v15, %v1496_v19  ;;  %v3209_v15 = vld [vmem:[%s3544_s26 + $0xf0] sm:$0xff] }
 0x239   : > { %1529 = vrot.lane.b32.xlu1 %v4353_v25, %s3427_s28  ;;  %1533 = vrot.lane.b32.xlu0 %v1351_v32, %s3427_s28  ;;  %v1354_v34 = vmax.f32 %v1306_v51, %v1334_v46  ;;  %v1353_v37 = vmax.f32 %v1305_v39, %v1335_v7  ;;  %v3215_v51 = vld [vmem:[%s3544_s26 + $0x120] sm:$0xff] }
 0x23a   : > { %1531 = vrot.lane.b32.xlu2 %v4384_v22, %s3427_s28  ;;  %3258 = vmatpush.bf16.msra.mxu2 %v3209_v15 }
 0x23b   : > { %v1466_v4 = vrot.slane %v1354_v34, 7  ;;  %v1465_v52 = vrot.slane %v1353_v37, 7  ;;  %v1497_v25 = vrot.slane %v1353_v37, 1  ;;  %v1498_v61 = vrot.slane %v1354_v34, 1  ;;  %1715 = vmatpush.bf16.msra.mxu1 %v3209_v15 }
 0x23d   : > { %v1478_v32 = vsel %vm526_vm0, %v1466_v4, %v1467_v49  ;;  %v4510_v22 = vsel %vm526_vm0, %v1464_v18, %v1465_v52  ;;  %v4514_v39 = vsel %vm526_vm0, %v1465_v52, %v1466_v4  ;;  %v4518_v45 = vsel %vm623_vm1, %v1496_v19, %v1497_v25  ;;  %v3216_v18 = vld [vmem:[%s3544_s26 + $0x128] sm:$0xff]  ;;  %v3214_v19 = vld [vmem:[%s3544_s26 + $0x118] sm:$0xff] }
 0x23e   : > { %v1609_v49 = vpack.c.bf16 %v4518_v45, %v4502_v16  ;;  %v4528_v43 = vsel %vm623_vm1, %v1498_v61, %v1499_v17  ;;  %v4532_v24 = vsel %vm623_vm1, %v1497_v25, %v1498_v61  ;;  %3259 = vmatpush.bf16.msra.mxu2 %v3208_v31  ;;  %v3206_v17 = vld [vmem:[%s3544_s26 + $0xd8] sm:$0xff]  ;;  %v3212_v25 = vld [vmem:[%s3544_s26 + $0x108] sm:$0xff]  ;;  %v3211_v61 = vld [vmem:[%s3544_s26 + $0x100] sm:$0xff] }
 0x23f   : > { %v1611_v1 = vpack.c.bf16 %v4528_v43, %v4532_v24  ;;  %1716 = vmatpush.bf16.msra.mxu1 %v3208_v31  ;;  %v4615_v16 = vld [vmem:[%s3601_s12] sm:$0xf]  ;;  %v3238_v45 = vld [vmem:[%s3544_s26 + $0x218] sm:$0xff]  ;;  %s2771_s12 = sshll.u32 %s340_s10, 4  ;;  %s2772_s12 = int_to_ptr.vmem [resolvable:$true] %s2771_s12 }
 0x240   : > { %v4623_v24 = vld [vmem:[%s3608_s19] sm:$0xf]  ;;  %s3369_s19 = sshra.s32 %s2774_s30, 4  ;;  %s3370_s19 = int_to_ptr.hbm [resolvable:$true] %s3369_s19 }
 0x241   : > { %1535 = vrot.lane.b32.xlu1 %v1416_v59, %s3427_s28  ;;  %1539 = vrot.lane.b32.xlu0 %v1354_v34, %s3427_s28  ;;  %v3217_v59 = vld [vmem:[%s3544_s26 + $0x130] sm:$0xff]  ;;  %s3371_s20 = scalar_lea.hbm %s3370_s19, 2  ;;  %p3376_p4 = scmp.lt.s32.totalorder %s3370_s19, %s4994_s6 }
 0x242   : > { %1537 = vrot.lane.b32.xlu2 %v1353_v37, %s3427_s28  ;;  %3260 = vmatpush.bf16.msra.mxu2 %v3207_v10  ;;  %v3213_v37 = vld [vmem:[%s3544_s26 + $0x110] sm:$0xff]  ;;  %p3372_p6 = scmp.ne.s32.totalorder %s3370_s19, %s3371_s20 }
 0x243   : > { %1717 = vmatpush.bf16.msra.mxu1 %v3207_v10 }
 0x244   : > { %p3373_p2 = pnand %p3372_p6, %p3510_p11 }
 0x246   : > { %3261 = vmatpush.bf16.msra.mxu2 %v3206_v17  ;;  %p3374_p3 = pneg %p3373_p2 }
 0x247   : > { %1718 = vmatpush.bf16.msra.mxu1 %v3206_v17 }
 0x24a   : > { %3262 = vmatpush.bf16.msra.mxu2 %v3205_v48 }
 0x24b   : > { %1719 = vmatpush.bf16.msra.mxu1 %v3205_v48 }
 0x24e   : > { %3263 = vmatpush.bf16.msra.mxu2 %v3204_v12 }
 0x24f   : > { %1720 = vmatpush.bf16.msra.mxu1 %v3204_v12 }
 0x252   : > { %3264 = vmatpush.bf16.msra.mxu2 %v3203_v36 }
 0x253   : > { %1721 = vmatpush.bf16.msra.mxu1 %v3203_v36 }
 0x256   : > { %1763 = vmatpush.bf16.msrb.mxu2 %v3218_v47 }
 0x257   : > { %2417 = vmatpush.bf16.msrb.mxu1 %v3242_v63 }
 0x25a   : > { %1764 = vmatpush.bf16.msrb.mxu2 %v3217_v59 }
 0x25e   : > { %1765 = vmatpush.bf16.msrb.mxu2 %v3216_v18 }
 0x262   : > { %1766 = vmatpush.bf16.msrb.mxu2 %v3215_v51 }
 0x266   : > { %1767 = vmatpush.bf16.msrb.mxu2 %v3214_v19 }
 0x26a   : > { %1768 = vmatpush.bf16.msrb.mxu2 %v3213_v37 }
 0x26b   : > { %v1542_v30 = vpop.permute.xlu0 %1541 }
 0x26c   : > { %v1563_v7 = vadd.f32 %v1542_v30, %v1478_v32 }
 0x26e   : > { %1769 = vmatpush.bf16.msrb.mxu2 %v3212_v25 }
 0x272   : > { %1770 = vmatpush.bf16.msrb.mxu2 %v3211_v61 }
 0x273   : > { %v1546_v52 = vpop.permute.xlu2 %1545 }
 0x274   : > { %v1565_v31 = vadd.f32 %v1546_v52, %v4366_v29 }
 0x283   : > { %v1544_v46 = vpop.permute.xlu1 %1543 }
 0x284   : > { %v1564_v34 = vadd.f32 %v1544_v46, %v4330_v21  ;;  %v1552_v10 = vpop.permute.xlu2 %1551 }
 0x285   : > { %v1568_v21 = vadd.f32 %v1552_v10, %v4438_v27 }
 0x286   : > { %v1612_v4 = vpack.c.bf16 %v1564_v34, %v1563_v7 }
 0x288   : > { %1747 = vmatmul.bf16.vlgmr.msra.gmra.mxu2 %v1612_v4 }
 0x28c   : > { %v1526_v47 = vpop.permute.xlu2 %1525 }
 0x28d   : > { %v1555_v19 = vadd.f32 %v1526_v47, %v4313_v5  ;;  %v3236_v47 = vld [vmem:[%s3544_s26 + $0x208] sm:$0xff] }
 0x293   : > { %v1548_v15 = vpop.permute.xlu0 %1547 }
 0x294   : > { %v1566_v17 = vadd.f32 %v1548_v15, %v4404_v44  ;;  %v1532_v34 = vpop.permute.xlu2 %1531 }
 0x296   : > { %v1614_v48 = vpack.c.bf16 %v1566_v17, %v1565_v31 }
 0x298   : > { %1752 = vmatmul.bf16.gmra.mxu2 %v1614_v48  ;;  %v3237_v48 = vld [vmem:[%s3544_s26 + $0x210] sm:$0xff] }
 0x29b   : > { %v1550_v32 = vpop.permute.xlu1 %1549  ;;  %v1522_v12 = vpop.permute.xlu0 %1521 }
 0x29c   : > { %v1567_v36 = vadd.f32 %v1550_v32, %v4433_v50  ;;  %v1553_v30 = vadd.f32 %v1522_v12, %v4444_v33  ;;  %v1558_v50 = vadd.f32 %v1532_v34, %v4423_v62  ;;  %v1538_v25 = vpop.permute.xlu2 %1537  ;;  %v3231_v62 = vld [vmem:[%s3544_s26 + $0x1e0] sm:$0xff] }
 0x29d   : > { %v1561_v15 = vadd.f32 %v1538_v25, %v4510_v22  ;;  %v4618_v22 = vperm.slane %v4615_v16, 2 }
 0x29e   : > { %v1616_v59 = vpack.c.bf16 %v1568_v21, %v1567_v36 }
 0x2a3   : > { %v1524_v18 = vpop.permute.xlu1 %1523  ;;  %v1528_v51 = vpop.permute.xlu0 %1527 }
 0x2a4   : > { %v1554_v29 = vadd.f32 %v1524_v18, %v4285_v56  ;;  %v1556_v44 = vadd.f32 %v1528_v51, %v4342_v2 }
 0x2a6   : > { %v1602_v46 = vpack.c.bf16 %v1554_v29, %v1553_v30  ;;  %v1604_v7 = vpack.c.bf16 %v1556_v44, %v1555_v19  ;;  %v3235_v30 = vld [vmem:[%s3544_s26 + $0x200] sm:$0xff] }
 0x2a8   : > { %1722 = vmatmul.bf16.vlgmr.msra.gmra.mxu1 %v1602_v46  ;;  %1757 = vmatmul.bf16.gmra.mxu2 %v1616_v59 }
 0x2ab   : > { %v1530_v27 = vpop.permute.xlu1 %1529  ;;  %v1534_v37 = vpop.permute.xlu0 %1533 }
 0x2ac   : > { %v1557_v4 = vadd.f32 %v1530_v27, %v4376_v23  ;;  %v1559_v33 = vadd.f32 %v1534_v37, %v4454_v26  ;;  %v3241_v26 = vld [vmem:[%s3544_s26 + $0x230] sm:$0xff] }
 0x2ad   : > { %2418 = vmatpush.bf16.msrb.mxu1 %v3241_v26 }
 0x2ae   : > { %v1606_v52 = vpack.c.bf16 %v1558_v50, %v1557_v4 }
 0x2b3   : > { %v1536_v5 = vpop.permute.xlu1 %1535  ;;  %v1540_v61 = vpop.permute.xlu0 %1539 }
 0x2b4   : > { %v1560_v56 = vadd.f32 %v1536_v5, %v4496_v3  ;;  %v1562_v2 = vadd.f32 %v1540_v61, %v4514_v39  ;;  %v3228_v3 = vld [vmem:[%s3544_s26 + $0x1c8] sm:$0xff] }
 0x2b6   : > { %v1608_v31 = vpack.c.bf16 %v1560_v56, %v1559_v33  ;;  %v1610_v23 = vpack.c.bf16 %v1562_v2, %v1561_v15 }
 0x2b8   : > { %1727 = vmatmul.bf16.gmra.mxu1 %v1604_v7  ;;  %1771 = vmatmul.bf16.vlgmr.msrb.gmra.mxu2 %v1603_v57 }
 0x2c8   : > { %1732 = vmatmul.bf16.gmra.mxu1 %v1606_v52  ;;  %1776 = vmatmul.bf16.gmra.mxu2 %v1605_v58  ;;  %v3233_v58 = vld [vmem:[%s3544_s26 + $0x1f0] sm:$0xff] }
 0x2c9   : > { %2369 = vmatpush.bf16.msrb.mxu0 %v3233_v58 }
 0x2d8   : > { %1737 = vmatmul.bf16.gmra.mxu1 %v1608_v31  ;;  %1781 = vmatmul.bf16.gmra.mxu2 %v1607_v14  ;;  %v3229_v14 = vld [vmem:[%s3544_s26 + $0x1d0] sm:$0xff] }
 0x2e8   : > { %1742 = vmatmul.bf16.gmra.mxu1 %v1610_v23  ;;  %1786 = vmatmul.bf16.gmra.mxu2 %v1609_v49  ;;  %v3227_v49 = vld [vmem:[%s3544_s26 + $0x1c0] sm:$0xff] }
 0x2f8   : > { %1791 = vmatmul.bf16.gmra.mxu2 %v1611_v1  ;;  %v4626_v1 = vperm.slane %v4623_v24, 2 }
 0x308   : > { %1796 = vmatmul.bf16.gmra.mxu2 %v1613_v9  ;;  %v3232_v9 = vld [vmem:[%s3544_s26 + $0x1e8] sm:$0xff] }
 0x309   : > { %2370 = vmatpush.bf16.msrb.mxu0 %v3232_v9 }
 0x30b   : > { %v4585_v54 = vpop.f32.mrf.mxu2 }
 0x30d   : > { %2371 = vmatpush.bf16.msrb.mxu0 %v3231_v62 }
 0x311   : > { %2372 = vmatpush.bf16.msrb.mxu0 %v3230_v11 }
 0x313   : > { %v4587_v28 = vpop.f32.mrf.mxu2 }
 0x315   : > { %2373 = vmatpush.bf16.msrb.mxu0 %v3229_v14 }
 0x318   : > { %1801 = vmatmul.bf16.gmra.mxu2 %v1615_v8  ;;  %v3240_v8 = vld [vmem:[%s3544_s26 + $0x228] sm:$0xff] }
 0x319   : > { %2419 = vmatpush.bf16.msrb.mxu1 %v3240_v8  ;;  %2374 = vmatpush.bf16.msrb.mxu0 %v3228_v3 }
 0x31b   : > { %v4592_v57 = vpop.f32.mrf.mxu2 }
 0x31d   : > { %2375 = vmatpush.bf16.msrb.mxu0 %v3227_v49 }
 0x323   : > { %v4594_v13 = vpop.f32.mrf.mxu2 }
 0x325   : > { %v1723_v55 = vpop.f32.mrf.mxu1 }
 0x328   : > { %1806 = vmatmul.bf16.gmra.mxu2 %v1617_v35  ;;  %v3239_v35 = vld [vmem:[%s3544_s26 + $0x220] sm:$0xff] }
 0x329   : > { %2420 = vmatpush.bf16.msrb.mxu1 %v3239_v35 }
 0x32b   : > { %v4601_v42 = vpop.f32.mrf.mxu2 }
 0x32d   : > { %v1725_v0 = vpop.f32.mrf.mxu1  ;;  %2421 = vmatpush.bf16.msrb.mxu1 %v3238_v45 }
 0x331   : > { %2422 = vmatpush.bf16.msrb.mxu1 %v3237_v48 }
 0x333   : > { %v4606_v60 = vpop.f32.mrf.mxu2 }
 0x335   : > { %v1728_v40 = vpop.f32.mrf.mxu1  ;;  %2423 = vmatpush.bf16.msrb.mxu1 %v3236_v47 }
 0x339   : > { %2424 = vmatpush.bf16.msrb.mxu1 %v3235_v30 }
 0x33b   : > { %v1772_v38 = vpop.f32.mrf.mxu2 }
 0x33c   : > { %v1773_v39 = vadd.f32 %v1772_v38, %v1723_v55 }
 0x33d   : > { %v1730_v12 = vpop.f32.mrf.mxu1 }
 0x33e   : > { %v1813_v10 = vmul.f32 %v4618_v22, %v1773_v39 }
 0x340   : > { %v1830_v21 = vadd.f32 %v4626_v1, %v1813_v10 }
 0x342   : > { %v1862_v51 = vmul.f32 0.01, %v1830_v21  ;;  %vm1846_vm13 = vcmp.ge.f32.partialorder %v1830_v21, 0.0 }
 0x343   : > { %v1774_v43 = vpop.f32.mrf.mxu2 }
 0x344   : > { %v1775_v17 = vadd.f32 %v1774_v43, %v1725_v0  ;;  %v4636_v46 = vsel %vm1846_vm13, %v1830_v21, %v1862_v51 }
 0x345   : > { %v1733_v27 = vpop.f32.mrf.mxu1  ;;  %v1894_v50 = vrot.slane %v4636_v46, 1 }
 0x346   : > { %v1814_v32 = vmul.f32 %v4618_v22, %v1775_v17 }
 0x348   : > { %v1831_v36 = vadd.f32 %v4626_v1, %v1814_v32 }
 0x34a   : > { %v1863_v59 = vmul.f32 0.01, %v1831_v36  ;;  %vm1847_vm12 = vcmp.ge.f32.partialorder %v1831_v36, 0.0 }
 0x34b   : > { %v1777_v18 = vpop.f32.mrf.mxu2 }
 0x34c   : > { %v1778_v19 = vadd.f32 %v1777_v18, %v1728_v40  ;;  %v1879_v29 = vsel %vm1847_vm12, %v1831_v36, %v1863_v59 }
 0x34d   : > { %v1895_v34 = vrot.slane %v1879_v29, 1  ;;  %v1735_v58 = vpop.f32.mrf.mxu1 }
 0x34e   : > { %v1815_v44 = vmul.f32 %v4618_v22, %v1778_v19 }
 0x34f   : > { %v1924_v61 = vsel %vm623_vm1, %v1894_v50, %v1895_v34 }
 0x350   : > { %v1832_v7 = vadd.f32 %v4626_v1, %v1815_v44  ;;  %v4649_v15 = vmax.f32 %v4636_v46, %v1924_v61 }
 0x352   : > { %vm1848_vm14 = vcmp.ge.f32.partialorder %v1832_v7, 0.0  ;;  %v1864_v37 = vmul.f32 0.01, %v1832_v7  ;;  %v2038_v0 = vrot.slane %v4649_v15, 7  ;;  %v2070_v39 = vrot.slane %v4649_v15, 1 }
 0x353   : > { %v1779_v4 = vpop.f32.mrf.mxu2 }
 0x354   : > { %v1880_v52 = vsel %vm1848_vm14, %v1832_v7, %v1864_v37  ;;  %v1780_v25 = vadd.f32 %v1779_v4, %v1730_v12 }
 0x355   : > { %v1896_v5 = vrot.slane %v1880_v52, 1  ;;  %v1738_v32 = vpop.f32.mrf.mxu1 }
 0x356   : > { %v1816_v33 = vmul.f32 %v4618_v22, %v1780_v25 }
 0x357   : > { %v1923_v56 = vsel %vm623_vm1, %v1895_v34, %v1896_v5 }
 0x358   : > { %v1833_v2 = vadd.f32 %v4626_v1, %v1816_v33  ;;  %v1927_v31 = vmax.f32 %v1879_v29, %v1923_v56 }
 0x35a   : > { %vm1849_vm15 = vcmp.ge.f32.partialorder %v1833_v2, 0.0  ;;  %v1865_v23 = vmul.f32 0.01, %v1833_v2  ;;  %v2152_v41 = vpack.c.bf16 %v1927_v31, %v4649_v15  ;;  %v2039_v26 = vrot.slane %v1927_v31, 7 }
 0x35b   : > { %v1782_v55 = vpop.f32.mrf.mxu2  ;;  %v2071_v35 = vrot.slane %v1927_v31, 1 }
 0x35c   : > { %v1881_v9 = vsel %vm1849_vm15, %v1833_v2, %v1865_v23  ;;  %v1783_v63 = vadd.f32 %v1782_v55, %v1733_v27  ;;  %2376 = vmatmul.bf16.vlgmr.msrb.gmra.mxu0 %v2152_v41  ;;  %v4660_v14 = vsel %vm526_vm0, %v2038_v0, %v2039_v26 }
 0x35d   : > { %v1897_v62 = vrot.slane %v1881_v9, 1  ;;  %v2100_v48 = vsel %vm623_vm1, %v2070_v39, %v2071_v35 }
 0x35e   : > { %v1817_v11 = vmul.f32 %v4618_v22, %v1783_v63 }
 0x35f   : > { %v1922_v8 = vsel %vm623_vm1, %v1896_v5, %v1897_v62 }
 0x360   : > { %v1834_v38 = vadd.f32 %v4626_v1, %v1817_v11  ;;  %v1928_v40 = vmax.f32 %v1880_v52, %v1922_v8  ;;  %v1740_v52 = vpop.f32.mrf.mxu1 }
 0x362   : > { %vm1850_vm2 = vcmp.ge.f32.partialorder %v1834_v38, 0.0  ;;  %v1866_v3 = vmul.f32 0.01, %v1834_v38  ;;  %v2072_v45 = vrot.slane %v1928_v40, 1  ;;  %v2040_v36 = vrot.slane %v1928_v40, 7 }
 0x363   : > { %v1784_v49 = vpop.f32.mrf.mxu2 }
 0x364   : > { %v1882_v43 = vsel %vm1850_vm2, %v1834_v38, %v1866_v3  ;;  %v1785_v10 = vadd.f32 %v1784_v49, %v1735_v58  ;;  %v2099_v17 = vsel %vm623_vm1, %v2071_v35, %v2072_v45  ;;  %v4675_v18 = vsel %vm526_vm0, %v2039_v26, %v2040_v36 }
 0x365   : > { %v1898_v12 = vrot.slane %v1882_v43, 1  ;;  %v2153_v21 = vpack.c.bf16 %v2099_v17, %v2100_v48 }
 0x366   : > { %v1818_v47 = vmul.f32 %v4618_v22, %v1785_v10 }
 0x367   : > { %2425 = vmatmul.bf16.vlgmr.msrb.gmra.mxu1 %v2153_v21  ;;  %v1921_v59 = vsel %vm623_vm1, %v1897_v62, %v1898_v12 }
 0x368   : > { %v1835_v51 = vadd.f32 %v4626_v1, %v1818_v47  ;;  %v1929_v19 = vmax.f32 %v1881_v9, %v1921_v59  ;;  %v1743_v49 = vpop.f32.mrf.mxu1 }
 0x36a   : > { %vm1851_vm4 = vcmp.ge.f32.partialorder %v1835_v51, 0.0  ;;  %v1867_v30 = vmul.f32 0.01, %v1835_v51  ;;  %v2155_v29 = vpack.c.bf16 %v1929_v19, %v1928_v40  ;;  %v2041_v37 = vrot.slane %v1929_v19, 7 }
 0x36b   : > { %v1787_v44 = vpop.f32.mrf.mxu2  ;;  %v2073_v56 = vrot.slane %v1929_v19, 1 }
 0x36c   : > { %v1883_v7 = vsel %vm1851_vm4, %v1835_v51, %v1867_v30  ;;  %v1788_v34 = vadd.f32 %v1787_v44, %v1738_v32  ;;  %2381 = vmatmul.bf16.gmra.mxu0 %v2155_v29  ;;  %v4683_v5 = vsel %vm526_vm0, %v2040_v36, %v2041_v37  ;;  %vm1957_vm4 = vcmp.lt.s32.totalorder %v3643_v53, 61 }
 0x36d   : > { %v1899_v27 = vrot.slane %v1883_v7, 1  ;;  %v2154_v2 = vpack.c.bf16 %v4683_v5, %v4675_v18  ;;  %v2098_v63 = vsel %vm623_vm1, %v2072_v45, %v2073_v56 }
 0x36e   : > { %v1819_v4 = vmul.f32 %v4618_v22, %v1788_v34 }
 0x36f   : > { %v1920_v25 = vsel %vm623_vm1, %v1898_v12, %v1899_v27  ;;  %v3226_v12 = vld [vmem:[%s3544_s26 + $0x1b8] sm:$0xff] }
 0x370   : > { %v1836_v61 = vadd.f32 %v4626_v1, %v1819_v4  ;;  %v1930_v33 = vmax.f32 %v1882_v43, %v1920_v25  ;;  %2319 = vmatpush.bf16.msrb.mxu3 %v3226_v12  ;;  %v1745_v34 = vpop.f32.mrf.mxu1 }
 0x372   : > { %vm1852_vm5 = vcmp.ge.f32.partialorder %v1836_v61, 0.0  ;;  %v1868_v31 = vmul.f32 0.01, %v1836_v61  ;;  %v2074_v23 = vrot.slane %v1930_v33, 1  ;;  %v2042_v8 = vrot.slane %v1930_v33, 7 }
 0x373   : > { %v1789_v41 = vpop.f32.mrf.mxu2 }
 0x374   : > { %v1884_v58 = vsel %vm1852_vm5, %v1836_v61, %v1868_v31  ;;  %v1790_v55 = vadd.f32 %v1789_v41, %v1740_v52  ;;  %v2097_v9 = vsel %vm623_vm1, %v2073_v56, %v2074_v23  ;;  %v4698_v3 = vsel %vm526_vm0, %v2041_v37, %v2042_v8  ;;  %v3225_v56 = vld [vmem:[%s3544_s26 + $0x1b0] sm:$0xff]  ;;  %vm3246_vm5 = vmpackc.low %vm1957_vm4, %vm3428_vm3 }
 0x375   : > { %v1900_v62 = vrot.slane %v1884_v58, 1  ;;  %v2156_v26 = vpack.c.bf16 %v2097_v9, %v2098_v63  ;;  %2320 = vmatpush.bf16.msrb.mxu3 %v3225_v56 }
 0x376   : > { %v1820_v11 = vmul.f32 %v4618_v22, %v1790_v55 }
 0x377   : > { %2430 = vmatmul.bf16.gmra.mxu1 %v2156_v26  ;;  %v1919_v38 = vsel %vm623_vm1, %v1899_v27, %v1900_v62 }
 0x378   : > { %v1837_v40 = vadd.f32 %v4626_v1, %v1820_v11  ;;  %v1931_v35 = vmax.f32 %v1883_v7, %v1919_v38 }
 0x37a   : > { %vm1853_vm6 = vcmp.ge.f32.partialorder %v1837_v40, 0.0  ;;  %v1869_v45 = vmul.f32 0.01, %v1837_v40  ;;  %v2158_v43 = vpack.c.bf16 %v1931_v35, %v1930_v33  ;;  %v2043_v21 = vrot.slane %v1931_v35, 7 }
 0x37b   : > { %v1792_v10 = vpop.f32.mrf.mxu2  ;;  %v2075_v30 = vrot.slane %v1931_v35, 1 }
 0x37c   : > { %v1885_v17 = vsel %vm1853_vm6, %v1837_v40, %v1869_v45  ;;  %v1793_v48 = vadd.f32 %v1792_v10, %v1743_v49  ;;  %2386 = vmatmul.bf16.gmra.mxu0 %v2158_v43  ;;  %v4706_v59 = vsel %vm526_vm0, %v2042_v8, %v2043_v21  ;;  %v3224_v49 = vld [vmem:[%s3544_s26 + $0x1a8] sm:$0xff]  ;;  %v3223_v10 = vld [vmem:[%s3544_s26 + $0x1a0] sm:$0xff] }
 0x37d   : > { %v1901_v32 = vrot.slane %v1885_v17, 1  ;;  %v2157_v29 = vpack.c.bf16 %v4706_v59, %v4698_v3  ;;  %v2096_v25 = vsel %vm623_vm1, %v2074_v23, %v2075_v30  ;;  %2321 = vmatpush.bf16.msrb.mxu3 %v3224_v49 }
 0x37e   : > { %v1821_v36 = vmul.f32 %v4618_v22, %v1793_v48 }
 0x37f   : > { %v1918_v47 = vsel %vm623_vm1, %v1900_v62, %v1901_v32 }
 0x380   : > { %v1838_v51 = vadd.f32 %v4626_v1, %v1821_v36  ;;  %v1932_v19 = vmax.f32 %v1884_v58, %v1918_v47 }
 0x381   : > { %2322 = vmatpush.bf16.msrb.mxu3 %v3223_v10 }
 0x382   : > { %vm1854_vm7 = vcmp.ge.f32.partialorder %v1838_v51, 0.0  ;;  %v1870_v44 = vmul.f32 0.01, %v1838_v51  ;;  %v2076_v7 = vrot.slane %v1932_v19, 1  ;;  %v2044_v31 = vrot.slane %v1932_v19, 7 }
 0x383   : > { %v1794_v27 = vpop.f32.mrf.mxu2 }
 0x384   : > { %v1886_v37 = vsel %vm1854_vm7, %v1838_v51, %v1870_v44  ;;  %v1795_v4 = vadd.f32 %v1794_v27, %v1745_v34  ;;  %v2095_v52 = vsel %vm623_vm1, %v2075_v30, %v2076_v7  ;;  %v4722_v55 = vsel %vm526_vm0, %v2043_v21, %v2044_v31 }
 0x385   : > { %v1902_v61 = vrot.slane %v1886_v37, 1  ;;  %v2159_v33 = vpack.c.bf16 %v2095_v52, %v2096_v25 }
 0x386   : > { %v1822_v41 = vmul.f32 %v4618_v22, %v1795_v4 }
 0x387   : > { %2435 = vmatmul.bf16.gmra.mxu1 %v2159_v33  ;;  %v1917_v58 = vsel %vm623_vm1, %v1901_v32, %v1902_v61 }
 0x388   : > { %v1839_v23 = vadd.f32 %v4626_v1, %v1822_v41  ;;  %v1933_v9 = vmax.f32 %v1885_v17, %v1917_v58 }
 0x38a   : > { %vm1855_vm10 = vcmp.ge.f32.partialorder %v1839_v23, 0.0  ;;  %v1871_v63 = vmul.f32 0.01, %v1839_v23  ;;  %v1997_v62 = vsel %vm1949_vm8, %v1933_v9, 0.0  ;;  %v3244_v26 = vpack.c.bf16 %v1933_v9, %v1932_v19 }
 0x38b   : > { %v1797_v11 = vpop.f32.mrf.mxu2  ;;  %v2045_v40 = vrot.slane %v1997_v62, 7  ;;  %v2077_v48 = vrot.slane %v1997_v62, 1 }
 0x38c   : > { %v1887_v8 = vsel %vm1855_vm10, %v1839_v23, %v1871_v63  ;;  %v1798_v38 = vadd.f32 %v1797_v11, %v4585_v54  ;;  %3245 = vmatmul.msk.bf16.gmra.mxu0 %vm3243_vm9, %v3244_v26 }
 0x38d   : > { %v1903_v35 = vrot.slane %v1887_v8, 1  ;;  %v4735_v12 = vsel %vm526_vm0, %v2044_v31, %v2045_v40  ;;  %v2094_v44 = vsel %vm623_vm1, %v2076_v7, %v2077_v48 }
 0x38e   : > { %v1823_v45 = vmul.f32 %v4618_v22, %v1798_v38  ;;  %v2160_v54 = vpack.c.bf16 %v4735_v12, %v4722_v55 }
 0x38f   : > { %v1916_v43 = vsel %vm623_vm1, %v1902_v61, %v1903_v35 }
 0x390   : > { %v1840_v17 = vadd.f32 %v4626_v1, %v1823_v45  ;;  %v1934_v32 = vmax.f32 %v1886_v37, %v1916_v43  ;;  %v3222_v37 = vld [vmem:[%s3544_s26 + $0x198] sm:$0xff]  ;;  %v3220_v45 = vld [vmem:[%s3544_s26 + $0x188] sm:$0xff] }
 0x391   : > { %2323 = vmatpush.bf16.msrb.mxu3 %v3222_v37 }
 0x392   : > { %vm1856_vm11 = vcmp.ge.f32.partialorder %v1840_v17, 0.0  ;;  %v1872_v21 = vmul.f32 0.01, %v1840_v17  ;;  %v2078_v36 = vrot.slane %v1934_v32, 1  ;;  %v2046_v4 = vrot.slane %v1934_v32, 7 }
 0x393   : > { %v1799_v47 = vpop.f32.mrf.mxu2 }
 0x394   : > { %v1888_v51 = vsel %vm1856_vm11, %v1840_v17, %v1872_v21  ;;  %v1800_v19 = vadd.f32 %v1799_v47, %v4587_v28  ;;  %v2093_v30 = vsel %vm623_vm1, %v2077_v48, %v2078_v36  ;;  %v4750_v28 = vsel %vm526_vm0, %v2045_v40, %v2046_v4  ;;  %v3221_v40 = vld [vmem:[%s3544_s26 + $0x190] sm:$0xff] }
 0x395   : > { %v1904_v34 = vrot.slane %v1888_v51, 1  ;;  %v2162_v27 = vpack.c.bf16 %v2093_v30, %v2094_v44  ;;  %2324 = vmatpush.bf16.msrb.mxu3 %v3221_v40  ;;  %v3219_v30 = vld [vmem:[%s3544_s26 + $0x180] sm:$0xff]  ;;  %s3375_s26 = scalar_lea.hbm %s4994_s6, 4 }
 0x396   : > { %v1824_v52 = vmul.f32 %v4618_v22, %v1800_v19  ;;  %p3377_p5 = scmp.lt.s32.totalorder %s3375_s26, %s3371_s20 }
 0x397   : > { %2440 = vmatmul.bf16.gmra.mxu1 %v2162_v27  ;;  %v1915_v25 = vsel %vm623_vm1, %v1903_v35, %v1904_v34 }
 0x398   : > { %v1841_v61 = vadd.f32 %v4626_v1, %v1824_v52  ;;  %v1935_v33 = vmax.f32 %v1887_v8, %v1915_v25  ;;  %p3378_p7 = por %p3377_p5, %p3376_p4 }
 0x399   : > { %2325 = vmatpush.bf16.msrb.mxu3 %v3220_v45 }
 0x39a   : > { %vm1857_vm12 = vcmp.ge.f32.partialorder %v1841_v61, 0.0  ;;  %v1873_v7 = vmul.f32 0.01, %v1841_v61  ;;  %v2164_v56 = vpack.c.bf16 %v1935_v33, %v1934_v32  ;;  %v2047_v9 = vrot.slane %v1935_v33, 7  ;;  %p3379_p8 = pnand %p3378_p7, %p3374_p3 }
 0x39b   : > { %v1802_v31 = vpop.f32.mrf.mxu2  ;;  %v2079_v38 = vrot.slane %v1935_v33, 1 }
 0x39c   : > { %v1889_v41 = vsel %vm1857_vm12, %v1841_v61, %v1873_v7  ;;  %v1803_v58 = vadd.f32 %v1802_v31, %v4592_v57  ;;  %2396 = vmatmul.bf16.gmra.mxu0 %v2164_v56  ;;  %v4759_v26 = vsel %vm526_vm0, %v2046_v4, %v2047_v9 }
 0x39d   : > { %v1905_v23 = vrot.slane %v1889_v41, 1  ;;  %v2163_v57 = vpack.c.bf16 %v4759_v26, %v4750_v28  ;;  %v2092_v32 = vsel %vm623_vm1, %v2078_v36, %v2079_v38  ;;  %2326 = vmatpush.bf16.msrb.mxu3 %v3219_v30 }
 0x39e   : > { %v1825_v63 = vmul.f32 %v4618_v22, %v1803_v58 }
 0x39f   : > { %v1914_v62 = vsel %vm623_vm1, %v1904_v34, %v1905_v23 }
 0x3a0   : > { %v1842_v11 = vadd.f32 %v4626_v1, %v1825_v63  ;;  %v1936_v8 = vmax.f32 %v1888_v51, %v1914_v62 }
 0x3a2   : > { %vm1858_vm13 = vcmp.ge.f32.partialorder %v1842_v11, 0.0  ;;  %v1874_v35 = vmul.f32 0.01, %v1842_v11  ;;  %v2080_v49 = vrot.slane %v1936_v8, 1  ;;  %v2048_v51 = vrot.slane %v1936_v8, 7 }
 0x3a3   : > { %v1804_v43 = vpop.f32.mrf.mxu2 }
 0x3a4   : > { %v1890_v10 = vsel %vm1858_vm13, %v1842_v11, %v1874_v35  ;;  %v1805_v17 = vadd.f32 %v1804_v43, %v4594_v13  ;;  %v2091_v48 = vsel %vm623_vm1, %v2079_v38, %v2080_v49  ;;  %v4777_v13 = vsel %vm526_vm0, %v2047_v9, %v2048_v51 }
 0x3a5   : > { %v1906_v21 = vrot.slane %v1890_v10, 1  ;;  %v2165_v47 = vpack.c.bf16 %v2091_v48, %v2092_v32 }
 0x3a6   : > { %v1826_v19 = vmul.f32 %v4618_v22, %v1805_v17 }
 0x3a7   : > { %2445 = vmatmul.bf16.gmra.mxu1 %v2165_v47  ;;  %v1913_v44 = vsel %vm623_vm1, %v1905_v23, %v1906_v21 }
 0x3a8   : > { %v1843_v34 = vadd.f32 %v4626_v1, %v1826_v19  ;;  %v1937_v27 = vmax.f32 %v1889_v41, %v1913_v44 }
 0x3aa   : > { %vm1859_vm14 = vcmp.ge.f32.partialorder %v1843_v34, 0.0  ;;  %v1875_v36 = vmul.f32 0.01, %v1843_v34  ;;  %v2167_v37 = vpack.c.bf16 %v1937_v27, %v1936_v8  ;;  %v2049_v33 = vrot.slane %v1937_v27, 7 }
 0x3ab   : > { %v1807_v4 = vpop.f32.mrf.mxu2  ;;  %v2081_v23 = vrot.slane %v1937_v27, 1 }
 0x3ac   : > { %v1891_v52 = vsel %vm1859_vm14, %v1843_v34, %v1875_v36  ;;  %v1808_v25 = vadd.f32 %v1807_v4, %v4601_v42  ;;  %2401 = vmatmul.bf16.gmra.mxu0 %v2167_v37  ;;  %v4786_v31 = vsel %vm526_vm0, %v2048_v51, %v2049_v33  ;;  %vm2603_vm14 = vcmp.lt.s32.totalorder %v3814_v6, 60 }
 0x3ad   : > { %v1907_v61 = vrot.slane %v1891_v52, 1  ;;  %v2166_v9 = vpack.c.bf16 %v4786_v31, %v4777_v13  ;;  %v2090_v40 = vsel %vm623_vm1, %v2080_v49, %v2081_v23 }
 0x3ae   : > { %v1827_v7 = vmul.f32 %v4618_v22, %v1808_v25 }
 0x3af   : > { %v1912_v56 = vsel %vm623_vm1, %v1906_v21, %v1907_v61 }
 0x3b0   : > { %v1844_v41 = vadd.f32 %v4626_v1, %v1827_v7  ;;  %v1938_v58 = vmax.f32 %v1890_v10, %v1912_v56 }
 0x3b2   : > { %vm1860_vm15 = vcmp.ge.f32.partialorder %v1844_v41, 0.0  ;;  %v1876_v42 = vmul.f32 0.01, %v1844_v41  ;;  %v2082_v63 = vrot.slane %v1938_v58, 1  ;;  %v2050_v43 = vrot.slane %v1938_v58, 7 }
 0x3b3   : > { %v1809_v62 = vpop.f32.mrf.mxu2 }
 0x3b4   : > { %v1892_v11 = vsel %vm1860_vm15, %v1844_v41, %v1876_v42  ;;  %v1810_v8 = vadd.f32 %v1809_v62, %v4606_v60  ;;  %v2089_v38 = vsel %vm623_vm1, %v2081_v23, %v2082_v63  ;;  %v2057_v48 = vsel %vm526_vm0, %v2049_v33, %v2050_v43 }
 0x3b5   : > { %v1908_v35 = vrot.slane %v1892_v11, 1  ;;  %v2168_v45 = vpack.c.bf16 %v2089_v38, %v2090_v40 }
 0x3b6   : > { %v1828_v10 = vmul.f32 %v4618_v22, %v1810_v8 }
 0x3b7   : > { %2450 = vmatmul.bf16.gmra.mxu1 %v2168_v45  ;;  %v1911_v17 = vsel %vm623_vm1, %v1907_v61, %v1908_v35 }
 0x3b8   : > { %v1845_v60 = vadd.f32 %v4626_v1, %v1828_v10  ;;  %v1939_v32 = vmax.f32 %v1891_v52, %v1911_v17  ;;  %v2735_v17 = vld [vmem:[%s4859_s29 + $0x70] sm:$0xff] }
 0x3ba   : > { %vm1861_vm2 = vcmp.ge.f32.partialorder %v1845_v60, 0.0  ;;  %v1877_v21 = vmul.f32 0.01, %v1845_v60  ;;  %v2170_v47 = vpack.c.bf16 %v1939_v32, %v1938_v58  ;;  %v2051_v19 = vrot.slane %v1939_v32, 7 }
 0x3bb   : > { %v2083_v34 = vrot.slane %v1939_v32, 1 }
 0x3bc   : > { %v1893_v51 = vsel %vm1861_vm2, %v1845_v60, %v1877_v21  ;;  %2406 = vmatmul.bf16.gmra.mxu0 %v2170_v47  ;;  %v2056_v1 = vsel %vm526_vm0, %v2050_v43, %v2051_v19 }
 0x3bd   : > { %v1909_v49 = vrot.slane %v1893_v51, 1  ;;  %v2169_v27 = vpack.c.bf16 %v2056_v1, %v2057_v48  ;;  %v2088_v4 = vsel %vm623_vm1, %v2082_v63, %v2083_v34  ;;  %v2736_v63 = vld [vmem:[%s4859_s29 + $0x78] sm:$0xff] }
 0x3be   : > { %2737 = vmatpush.msra.mxu2 %v2736_v63 }
 0x3bf   : > { %v1925_v22 = vsel %vm623_vm1, %v1909_v49, %v1894_v50  ;;  %v1910_v30 = vsel %vm623_vm1, %v1908_v35, %v1909_v49 }
 0x3c0   : > { %v1941_v44 = vmax.f32 %v1893_v51, %v1925_v22  ;;  %v1940_v13 = vmax.f32 %v1892_v11, %v1910_v30  ;;  %2738 = vmatpush.msra.mxu2 %v2735_v17 }
 0x3c2   : > { %v2084_v36 = vrot.slane %v1940_v13, 1  ;;  %v2005_v37 = vsel %vm1957_vm4, %v1941_v44, 0.0  ;;  %v2052_v33 = vrot.slane %v1940_v13, 7  ;;  %v3247_v41 = vpack.c.bf16 %v1941_v44, %v1940_v13 }
 0x3c3   : > { %v2053_v46 = vrot.slane %v2005_v37, 7  ;;  %v2085_v58 = vrot.slane %v2005_v37, 1 }
 0x3c4   : > { %v2087_v50 = vsel %vm623_vm1, %v2083_v34, %v2084_v36  ;;  %v2055_v56 = vsel %vm526_vm0, %v2051_v19, %v2052_v33  ;;  %v2734_v34 = vld [vmem:[%s4859_s29 + $0x68] sm:$0xff] }
 0x3c5   : > { %v2171_v52 = vpack.c.bf16 %v2087_v50, %v2088_v4  ;;  %v2069_v25 = vsel %vm526_vm0, %v2053_v46, %v2038_v0  ;;  %v2054_v7 = vsel %vm526_vm0, %v2052_v33, %v2053_v46  ;;  %v2086_v0 = vsel %vm623_vm1, %v2084_v36, %v2085_v58  ;;  %2739 = vmatpush.msra.mxu2 %v2734_v34 }
 0x3c6   : > { %v2151_v61 = vpack.c.bf16 %v4660_v14, %v2069_v25  ;;  %v2172_v31 = vpack.c.bf16 %v2054_v7, %v2055_v56  ;;  %v2101_v14 = vsel %vm623_vm1, %v2085_v58, %v2070_v39 }
 0x3c7   : > { %2455 = vmatmul.bf16.gmra.mxu1 %v2171_v52  ;;  %v2174_v23 = vpack.c.bf16 %v2101_v14, %v2086_v0 }
 0x3c8   : > { %2327 = vmatmul.bf16.vlgmr.msrb.gmra.mxu3 %v2151_v61 }
 0x3cc   : > { %3248 = vmatmul.msk.bf16.gmra.mxu0 %vm3246_vm5, %v3247_v41  ;;  %v2733_v41 = vld [vmem:[%s4859_s29 + $0x60] sm:$0xff] }
 0x3cd   : > { %2740 = vmatpush.msra.mxu2 %v2733_v41 }
 0x3d7   : > { %2460 = vmatmul.bf16.gmra.mxu1 %v2174_v23 }
 0x3d8   : > { %2332 = vmatmul.bf16.gmra.mxu3 %v2154_v2 }
 0x3d9   : > { %v2377_v15 = vpop.f32.mrf.mxu0 }
 0x3e1   : > { %v2379_v42 = vpop.f32.mrf.mxu0 }
 0x3e4   : > { %v2426_v39 = vpop.f32.mrf.mxu1 }
 0x3e8   : > { %2337 = vmatmul.bf16.gmra.mxu3 %v2157_v29  ;;  %v4848_v29 = vperm.slane %v4615_v16, 3 }
 0x3e9   : > { %v2382_v5 = vpop.f32.mrf.mxu0 }
 0x3ec   : > { %v2428_v18 = vpop.f32.mrf.mxu1 }
 0x3f1   : > { %v2384_v3 = vpop.f32.mrf.mxu0 }
 0x3f4   : > { %v2431_v2 = vpop.f32.mrf.mxu1 }
 0x3f8   : > { %2342 = vmatmul.bf16.gmra.mxu3 %v2160_v54  ;;  %v4851_v54 = vperm.slane %v4623_v24, 3 }
 0x3f9   : > { %v2387_v62 = vpop.f32.mrf.mxu0 }
 0x3fc   : > { %v2433_v12 = vpop.f32.mrf.mxu1 }
 0x401   : > { %v2389_v32 = vpop.f32.mrf.mxu0 }
 0x404   : > { %v2436_v11 = vpop.f32.mrf.mxu1 }
 0x408   : > { %2347 = vmatmul.bf16.gmra.mxu3 %v2163_v57 }
 0x409   : > { %v2392_v50 = vpop.f32.mrf.mxu0 }
 0x40c   : > { %v2438_v49 = vpop.f32.mrf.mxu1 }
 0x414   : > { %v2441_v61 = vpop.f32.mrf.mxu1 }
 0x418   : > { %2352 = vmatmul.bf16.gmra.mxu3 %v2166_v9 }
 0x428   : > { %2357 = vmatmul.bf16.gmra.mxu3 %v2169_v27 }
 0x438   : > { %2362 = vmatmul.bf16.gmra.mxu3 %v2172_v31 }
 0x44b   : > { %v2328_v59 = vpop.f32.mrf.mxu3 }
 0x44c   : > { %v2378_v55 = vadd.f32 %v2377_v15, %v2328_v59 }
 0x44e   : > { %v2427_v28 = vadd.f32 %v2426_v39, %v2378_v55  ;;  %v2732_v55 = vld [vmem:[%s4859_s29 + $0x58] sm:$0xff] }
 0x44f   : > { %2741 = vmatpush.msra.mxu2 %v2732_v55 }
 0x450   : > { %v2467_v26 = vmul.f32 %v4848_v29, %v2427_v28 }
 0x452   : > { %v2484_v57 = vadd.f32 %v4851_v54, %v2467_v26 }
 0x453   : > { %v2330_v9 = vpop.f32.mrf.mxu3 }
 0x454   : > { %v2380_v16 = vadd.f32 %v2379_v42, %v2330_v9  ;;  %v2516_v8 = vmul.f32 0.01, %v2484_v57  ;;  %vm2500_vm0 = vcmp.ge.f32.partialorder %v2484_v57, 0.0 }
 0x456   : > { %v2429_v24 = vadd.f32 %v2428_v18, %v2380_v16  ;;  %v4865_v45 = vsel %vm2500_vm0, %v2484_v57, %v2516_v8  ;;  %v2394_v18 = vpop.f32.mrf.mxu0 }
 0x457   : > { %v2548_v21 = vrot.slane %v4865_v45, 1 }
 0x458   : > { %v2468_v38 = vmul.f32 %v4848_v29, %v2429_v24  ;;  %v2731_v24 = vld [vmem:[%s4859_s29 + $0x50] sm:$0xff] }
 0x459   : > { %2742 = vmatpush.msra.mxu2 %v2731_v24 }
 0x45a   : > { %v2485_v40 = vadd.f32 %v4851_v54, %v2468_v38 }
 0x45b   : > { %v2333_v35 = vpop.f32.mrf.mxu3 }
 0x45c   : > { %vm2501_vm6 = vcmp.ge.f32.partialorder %v2485_v40, 0.0  ;;  %v2517_v43 = vmul.f32 0.01, %v2485_v40  ;;  %v2383_v10 = vadd.f32 %v2382_v5, %v2333_v35 }
 0x45e   : > { %v2533_v48 = vsel %vm2501_vm6, %v2485_v40, %v2517_v43  ;;  %v2432_v60 = vadd.f32 %v2431_v2, %v2383_v10  ;;  %v2397_v35 = vpop.f32.mrf.mxu0 }
 0x45f   : > { %v2549_v47 = vrot.slane %v2533_v48, 1 }
 0x460   : > { %v2469_v51 = vmul.f32 %v4848_v29, %v2432_v60 }
 0x461   : > { %v2578_v19 = vsel %vm623_vm1, %v2548_v21, %v2549_v47 }
 0x462   : > { %v2580_v22 = vmax.f32 %v4865_v45, %v2578_v19  ;;  %v2486_v30 = vadd.f32 %v4851_v54, %v2469_v51 }
 0x463   : > { %v2335_v1 = vpop.f32.mrf.mxu3 }
 0x464   : > { %vm2502_vm7 = vcmp.ge.f32.partialorder %v2486_v30, 0.0  ;;  %v2518_v44 = vmul.f32 0.01, %v2486_v30  ;;  %v2385_v13 = vadd.f32 %v2384_v3, %v2335_v1 }
 0x466   : > { %v2534_v27 = vsel %vm2502_vm7, %v2486_v30, %v2518_v44  ;;  %v2434_v36 = vadd.f32 %v2433_v12, %v2385_v13  ;;  %v2443_v12 = vpop.f32.mrf.mxu1  ;;  %v2399_v34 = vpop.f32.mrf.mxu0  ;;  %vm2611_vm7 = vcmp.lt.s32.totalorder %v3643_v53, 60 }
 0x467   : > { %v2550_v37 = vrot.slane %v2534_v27, 1 }
 0x468   : > { %v2470_v46 = vmul.f32 %v4848_v29, %v2434_v36 }
 0x469   : > { %v2577_v4 = vsel %vm623_vm1, %v2549_v47, %v2550_v37 }
 0x46a   : > { %v2581_v52 = vmax.f32 %v2533_v48, %v2577_v4  ;;  %v2487_v25 = vadd.f32 %v4851_v54, %v2470_v46 }
 0x46b   : > { %v2338_v33 = vpop.f32.mrf.mxu3 }
 0x46c   : > { %v2684_v7 = vadd.f32 %v2581_v52, %v2580_v22  ;;  %vm2503_vm8 = vcmp.ge.f32.partialorder %v2487_v25, 0.0  ;;  %v2519_v56 = vmul.f32 0.01, %v2487_v25  ;;  %v2388_v31 = vadd.f32 %v2387_v62, %v2338_v33 }
 0x46e   : > { %v2535_v58 = vsel %vm2503_vm8, %v2487_v25, %v2519_v56  ;;  %v2437_v0 = vadd.f32 %v2436_v11, %v2388_v31  ;;  %v2446_v17 = vpop.f32.mrf.mxu1 }
 0x46f   : > { %v2551_v14 = vrot.slane %v2535_v58, 1 }
 0x470   : > { %v2471_v23 = vmul.f32 %v4848_v29, %v2437_v0  ;;  %v2402_v0 = vpop.f32.mrf.mxu0 }
 0x471   : > { %v2576_v15 = vsel %vm623_vm1, %v2550_v37, %v2551_v14 }
 0x472   : > { %v2582_v39 = vmax.f32 %v2534_v27, %v2576_v15  ;;  %v2488_v42 = vadd.f32 %v4851_v54, %v2471_v23 }
 0x473   : > { %v2340_v5 = vpop.f32.mrf.mxu3 }
 0x474   : > { %v2685_v2 = vadd.f32 %v2684_v7, %v2582_v39  ;;  %vm2504_vm3 = vcmp.ge.f32.partialorder %v2488_v42, 0.0  ;;  %v2520_v3 = vmul.f32 0.01, %v2488_v42  ;;  %v2390_v59 = vadd.f32 %v2389_v32, %v2340_v5  ;;  %v2729_v7 = vld [vmem:[%s4859_s29 + $0x40] sm:$0xff] }
 0x476   : > { %v2536_v28 = vsel %vm2504_vm3, %v2488_v42, %v2520_v3  ;;  %v2439_v26 = vadd.f32 %v2438_v49, %v2390_v59  ;;  %v2730_v49 = vld [vmem:[%s4859_s29 + $0x48] sm:$0xff]  ;;  %v2448_v37 = vpop.f32.mrf.mxu1  ;;  %v2728_v3 = vld [vmem:[%s4859_s29 + $0x38] sm:$0xff] }
 0x477   : > { %v2552_v57 = vrot.slane %v2536_v28, 1  ;;  %2743 = vmatpush.msra.mxu2 %v2730_v49 }
 0x478   : > { %v2472_v9 = vmul.f32 %v4848_v29, %v2439_v26 }
 0x479   : > { %v2575_v16 = vsel %vm623_vm1, %v2551_v14, %v2552_v57  ;;  %2744 = vmatpush.msra.mxu2 %v2729_v7 }
 0x47a   : > { %v2583_v63 = vmax.f32 %v2535_v58, %v2575_v16  ;;  %v2489_v62 = vadd.f32 %v4851_v54, %v2472_v9  ;;  %v2404_v16 = vpop.f32.mrf.mxu0 }
 0x47b   : > { %v2343_v11 = vpop.f32.mrf.mxu3  ;;  %2745 = vmatpush.msra.mxu2 %v2728_v3  ;;  %v2724_v3 = vld [vmem:[%s4859_s29 + $0x18] sm:$0xff] }
 0x47c   : > { %v2686_v8 = vadd.f32 %v2685_v2, %v2583_v63  ;;  %vm2505_vm9 = vcmp.ge.f32.partialorder %v2489_v62, 0.0  ;;  %v2521_v38 = vmul.f32 0.01, %v2489_v62  ;;  %v2393_v40 = vadd.f32 %v2392_v50, %v2343_v11  ;;  %v2727_v11 = vld [vmem:[%s4859_s29 + $0x30] sm:$0xff] }
 0x47d   : > { %2746 = vmatpush.msra.mxu2 %v2727_v11  ;;  %v2721_v11 = vld [vmem:[%s4859_s29] sm:$0xff] }
 0x47e   : > { %v2537_v43 = vsel %vm2505_vm9, %v2489_v62, %v2521_v38  ;;  %v2442_v10 = vadd.f32 %v2441_v61, %v2393_v40  ;;  %v2451_v39 = vpop.f32.mrf.mxu1 }
 0x47f   : > { %v2553_v48 = vrot.slane %v2537_v43, 1 }
 0x480   : > { %v2473_v60 = vmul.f32 %v4848_v29, %v2442_v10 }
 0x481   : > { %v2574_v32 = vsel %vm623_vm1, %v2552_v57, %v2553_v48 }
 0x482   : > { %v2584_v47 = vmax.f32 %v2536_v28, %v2574_v32  ;;  %v2490_v51 = vadd.f32 %v4851_v54, %v2473_v60 }
 0x483   : > { %v2345_v19 = vpop.f32.mrf.mxu3 }
 0x484   : > { %v2687_v22 = vadd.f32 %v2686_v8, %v2584_v47  ;;  %vm2506_vm10 = vcmp.ge.f32.partialorder %v2490_v51, 0.0  ;;  %v2522_v30 = vmul.f32 0.01, %v2490_v51  ;;  %v2395_v1 = vadd.f32 %v2394_v18, %v2345_v19  ;;  %v2726_v19 = vld [vmem:[%s4859_s29 + $0x28] sm:$0xff] }
 0x485   : > { %2747 = vmatpush.msra.mxu2 %v2726_v19 }
 0x486   : > { %v2538_v44 = vsel %vm2506_vm10, %v2490_v51, %v2522_v30  ;;  %v2444_v13 = vadd.f32 %v2443_v12, %v2395_v1  ;;  %v2453_v8 = vpop.f32.mrf.mxu1 }
 0x487   : > { %v2554_v27 = vrot.slane %v2538_v44, 1 }
 0x488   : > { %v2474_v36 = vmul.f32 %v4848_v29, %v2444_v13 }
 0x489   : > { %v2573_v46 = vsel %vm623_vm1, %v2553_v48, %v2554_v27 }
 0x48a   : > { %v2585_v50 = vmax.f32 %v2537_v43, %v2573_v46  ;;  %v2491_v4 = vadd.f32 %v4851_v54, %v2474_v36 }
 0x48b   : > { %v2348_v52 = vpop.f32.mrf.mxu3 }
 0x48c   : > { %v2688_v25 = vadd.f32 %v2687_v22, %v2585_v50  ;;  %vm2507_vm11 = vcmp.ge.f32.partialorder %v2491_v4, 0.0  ;;  %v2523_v61 = vmul.f32 0.01, %v2491_v4  ;;  %v2398_v33 = vadd.f32 %v2397_v35, %v2348_v52  ;;  %v2407_v22 = vpop.f32.mrf.mxu0 }
 0x48e   : > { %v2539_v56 = vsel %vm2507_vm11, %v2491_v4, %v2523_v61  ;;  %v2447_v31 = vadd.f32 %v2446_v17, %v2398_v33  ;;  %v2456_v1 = vpop.f32.mrf.mxu1 }
 0x48f   : > { %v2555_v41 = vrot.slane %v2539_v56, 1 }
 0x490   : > { %v2475_v58 = vmul.f32 %v4848_v29, %v2447_v31 }
 0x491   : > { %v2572_v14 = vsel %vm623_vm1, %v2554_v27, %v2555_v41 }
 0x492   : > { %v2586_v23 = vmax.f32 %v2538_v44, %v2572_v14  ;;  %v2492_v15 = vadd.f32 %v4851_v54, %v2475_v58 }
 0x493   : > { %v2350_v42 = vpop.f32.mrf.mxu3 }
 0x494   : > { %v2689_v18 = vadd.f32 %v2688_v25, %v2586_v23  ;;  %vm2508_vm12 = vcmp.ge.f32.partialorder %v2492_v15, 0.0  ;;  %v2524_v5 = vmul.f32 0.01, %v2492_v15  ;;  %v2400_v2 = vadd.f32 %v2399_v34, %v2350_v42  ;;  %v2409_v33 = vpop.f32.mrf.mxu0 }
 0x496   : > { %v2540_v59 = vsel %vm2508_vm12, %v2492_v15, %v2524_v5  ;;  %v2449_v55 = vadd.f32 %v2448_v37, %v2400_v2  ;;  %v2725_v37 = vld [vmem:[%s4859_s29 + $0x20] sm:$0xff]  ;;  %v2458_v31 = vpop.f32.mrf.mxu1 }
 0x497   : > { %v2556_v12 = vrot.slane %v2540_v59, 1  ;;  %2748 = vmatpush.msra.mxu2 %v2725_v37 }
 0x498   : > { %v2476_v28 = vmul.f32 %v4848_v29, %v2449_v55 }
 0x499   : > { %v2571_v26 = vsel %vm623_vm1, %v2555_v41, %v2556_v12  ;;  %2749 = vmatpush.msra.mxu2 %v2724_v3 }
 0x49a   : > { %v2587_v57 = vmax.f32 %v2539_v56, %v2571_v26  ;;  %v2493_v9 = vadd.f32 %v4851_v54, %v2476_v28 }
 0x49b   : > { %v2353_v63 = vpop.f32.mrf.mxu3 }
 0x49c   : > { %vm2509_vm13 = vcmp.ge.f32.partialorder %v2493_v9, 0.0  ;;  %v2525_v62 = vmul.f32 0.01, %v2493_v9  ;;  %v2403_v24 = vadd.f32 %v2402_v0, %v2353_v63  ;;  %v2651_v43 = vsel %vm2603_vm14, %v2587_v57, 0.0  ;;  %v2412_v55 = vpop.f32.mrf.mxu0  ;;  %v2722_v57 = vld [vmem:[%s4859_s29 + $0x8] sm:$0xff] }
 0x49d   : > { %v4914_v17 = vadd.f32 %v2689_v18, %v2651_v43 }
 0x49e   : > { %v2541_v38 = vsel %vm2509_vm13, %v2493_v9, %v2525_v62  ;;  %v2452_v40 = vadd.f32 %v2451_v39, %v2403_v24  ;;  %v2461_v9 = vpop.f32.mrf.mxu1 }
 0x49f   : > { %v2557_v35 = vrot.slane %v2541_v38, 1 }
 0x4a0   : > { %v2477_v10 = vmul.f32 %v4848_v29, %v2452_v40 }
 0x4a1   : > { %v2570_v48 = vsel %vm623_vm1, %v2556_v12, %v2557_v35 }
 0x4a2   : > { %v2588_v60 = vmax.f32 %v2540_v59, %v2570_v48  ;;  %v2494_v32 = vadd.f32 %v4851_v54, %v2477_v10  ;;  %v2723_v59 = vld [vmem:[%s4859_s29 + $0x10] sm:$0xff] }
 0x4a3   : > { %v2355_v47 = vpop.f32.mrf.mxu3  ;;  %2750 = vmatpush.msra.mxu2 %v2723_v59 }
 0x4a4   : > { %vm2510_vm15 = vcmp.ge.f32.partialorder %v2494_v32, 0.0  ;;  %v2526_v51 = vmul.f32 0.01, %v2494_v32  ;;  %v2405_v49 = vadd.f32 %v2404_v16, %v2355_v47 }
 0x4a5   : > { %2751 = vmatpush.msra.mxu2 %v2722_v57 }
 0x4a6   : > { %v2542_v6 = vsel %vm2510_vm15, %v2494_v32, %v2526_v51  ;;  %v2454_v30 = vadd.f32 %v2453_v8, %v2405_v49  ;;  %v2463_v19 = vpop.f32.mrf.mxu1 }
 0x4a7   : > { %v2558_v44 = vrot.slane %v2542_v6, 1  ;;  %2752 = vmatpush.msra.mxu2 %v2721_v11 }
 0x4a8   : > { %v2478_v13 = vmul.f32 %v4848_v29, %v2454_v30 }
 0x4a9   : > { %v2569_v34 = vsel %vm623_vm1, %v2557_v35, %v2558_v44 }
 0x4aa   : > { %v2589_v27 = vmax.f32 %v2541_v38, %v2569_v34  ;;  %v2495_v36 = vadd.f32 %v4851_v54, %v2478_v13 }
 0x4ab   : > { %v2358_v46 = vpop.f32.mrf.mxu3 }
 0x4ac   : > { %v2705_v50 = vadd.f32 %v2589_v27, %v2588_v60  ;;  %vm2511_vm2 = vcmp.ge.f32.partialorder %v2495_v36, 0.0  ;;  %v2527_v4 = vmul.f32 0.01, %v2495_v36  ;;  %v2408_v52 = vadd.f32 %v2407_v22, %v2358_v46  ;;  %v2414_v60 = vpop.f32.mrf.mxu0 }
 0x4ad   : > { %v2691_v46 = vrot.slane %v4914_v17, 4 }
 0x4ae   : > { %v2543_v25 = vsel %vm2511_vm2, %v2495_v36, %v2527_v4  ;;  %v2457_v61 = vadd.f32 %v2456_v1, %v2408_v52 }
 0x4af   : > { %v2559_v7 = vrot.slane %v2543_v25, 1 }
 0x4b0   : > { %v2479_v56 = vmul.f32 %v4848_v29, %v2457_v61 }
 0x4b1   : > { %v2568_v41 = vsel %vm623_vm1, %v2558_v44, %v2559_v7 }
 0x4b2   : > { %v2590_v58 = vmax.f32 %v2542_v6, %v2568_v41  ;;  %v2496_v0 = vadd.f32 %v4851_v54, %v2479_v56 }
 0x4b3   : > { %v2360_v14 = vpop.f32.mrf.mxu3 }
 0x4b4   : > { %v2706_v23 = vadd.f32 %v2705_v50, %v2590_v58  ;;  %vm2512_vm4 = vcmp.ge.f32.partialorder %v2496_v0, 0.0  ;;  %v2528_v15 = vmul.f32 0.01, %v2496_v0  ;;  %v2410_v39 = vadd.f32 %v2409_v33, %v2360_v14 }
 0x4b6   : > { %v2544_v42 = vsel %vm2512_vm4, %v2496_v0, %v2528_v15  ;;  %v2459_v18 = vadd.f32 %v2458_v31, %v2410_v39 }
 0x4b7   : > { %v2560_v5 = vrot.slane %v2544_v42, 1 }
 0x4b8   : > { %v2480_v2 = vmul.f32 %v4848_v29, %v2459_v18 }
 0x4b9   : > { %v2567_v12 = vsel %vm623_vm1, %v2559_v7, %v2560_v5 }
 0x4ba   : > { %v2591_v28 = vmax.f32 %v2543_v25, %v2567_v12  ;;  %v2497_v26 = vadd.f32 %v4851_v54, %v2480_v2 }
 0x4bb   : > { %v2363_v16 = vpop.f32.mrf.mxu3 }
 0x4bc   : > { %v2707_v63 = vadd.f32 %v2706_v23, %v2591_v28  ;;  %vm2513_vm5 = vcmp.ge.f32.partialorder %v2497_v26, 0.0  ;;  %v2529_v62 = vmul.f32 0.01, %v2497_v26  ;;  %v2413_v24 = vadd.f32 %v2412_v55, %v2363_v16 }
 0x4be   : > { %v2545_v8 = vsel %vm2513_vm5, %v2497_v26, %v2529_v62  ;;  %v2462_v38 = vadd.f32 %v2461_v9, %v2413_v24 }
 0x4bf   : > { %v2561_v40 = vrot.slane %v2545_v8, 1 }
 0x4c0   : > { %v2481_v35 = vmul.f32 %v4848_v29, %v2462_v38 }
 0x4c1   : > { %v2566_v43 = vsel %vm623_vm1, %v2560_v5, %v2561_v40 }
 0x4c2   : > { %v2592_v10 = vmax.f32 %v2544_v42, %v2566_v43  ;;  %v2498_v48 = vadd.f32 %v4851_v54, %v2481_v35 }
 0x4c3   : > { %v2365_v32 = vpop.f32.mrf.mxu3 }
 0x4c4   : > { %v2708_v47 = vadd.f32 %v2707_v63, %v2592_v10  ;;  %vm2514_vm0 = vcmp.ge.f32.partialorder %v2498_v48, 0.0  ;;  %v2530_v51 = vmul.f32 0.01, %v2498_v48  ;;  %v2415_v49 = vadd.f32 %v2414_v60, %v2365_v32 }
 0x4c6   : > { %v2546_v22 = vsel %vm2514_vm0, %v2498_v48, %v2530_v51  ;;  %v2464_v6 = vadd.f32 %v2463_v19, %v2415_v49 }
 0x4c7   : > { %v2562_v30 = vrot.slane %v2546_v22, 1 }
 0x4c8   : > { %v2482_v1 = vmul.f32 %v4848_v29, %v2464_v6 }
 0x4c9   : > { %v2565_v44 = vsel %vm623_vm1, %v2561_v40, %v2562_v30 }
 0x4ca   : > { %v2593_v13 = vmax.f32 %v2545_v8, %v2565_v44  ;;  %v2499_v34 = vadd.f32 %v4851_v54, %v2482_v1  ;;  %v2692_v54 = vadd.f32 %v2691_v46, %v4914_v17 }
 0x4cc   : > { %vm2515_vm6 = vcmp.ge.f32.partialorder %v2499_v34, 0.0  ;;  %v2531_v27 = vmul.f32 0.01, %v2499_v34  ;;  %v2709_v36 = vadd.f32 %v2708_v47, %v2593_v13  ;;  %v2693_v56 = vrot.slane %v2692_v54, 2 }
 0x4ce   : > { %v2547_v37 = vsel %vm2515_vm6, %v2499_v34, %v2531_v27  ;;  %v2694_v41 = vadd.f32 %v2693_v56, %v2692_v54 }
 0x4cf   : > { %v2563_v50 = vrot.slane %v2547_v37, 1 }
 0x4d0   : > { %v2695_v45 = vrot.slane %v2694_v41, 1 }
 0x4d1   : > { %v2564_v4 = vsel %vm623_vm1, %v2562_v30, %v2563_v50  ;;  %v2579_v29 = vsel %vm623_vm1, %v2563_v50, %v2548_v21  ;;  %vm2718_vm1 = vcmask 1040384  }
 0x4d2   : > { %v2594_v52 = vmax.f32 %v2546_v22, %v2564_v4  ;;  %v2595_v25 = vmax.f32 %v2547_v37, %v2579_v29  ;;  %v2696_v53 = vadd.f32 %v2695_v45, %v2694_v41 }
 0x4d4   : > { %v2659_v61 = vsel %vm2611_vm7, %v2595_v25, 0.0  ;;  %v2710_v33 = vadd.f32 %v2709_v36, %v2594_v52 }
 0x4d6   : > { %v2711_v7 = vadd.f32 %v2710_v33, %v2659_v61 }
 0x4d8   : > { %v2712_v31 = vrot.slane %v2711_v7, 4 }
 0x4da   : > { %v2713_v58 = vadd.f32 %v2712_v31, %v2711_v7 }
 0x4dc   : > { %v2714_v0 = vrot.slane %v2713_v58, 2 }
 0x4de   : > { %v2715_v14 = vadd.f32 %v2714_v0, %v2713_v58 }
 0x4e0   : > { %v2716_v20 = vrot.slane %v2715_v14, 1 }
 0x4e2   : > { %v2717_v21 = vadd.f32 %v2716_v20, %v2715_v14 }
 0x4e4   : > { %v2719_v23 = vsel %vm2718_vm1, %v2696_v53, %v2717_v21 }
 0x4e5   : > { %v2720_v15 = vmul.f32 0.016666668, %v2719_v23 }
 0x4e7   : > { %2753 = vmatmul.f32.vlgmr.msra.gmra.mxu2 %v2720_v15 }
 0x56a   : > { %v2754_v17 = vpop.f32.mrf.mxu2 }
 0x56b   : > { %2757 = vst [vmem:[%s340_s10] sm:$0x3] %v2754_v17 }
 0x56c   : > { %3382 = shalt.err (!%p3379_p8)
}
 0x56d   : > { %3270 = dma.vmem_to_hbm [thread:$0]  (%p3510_p11), %s2772_s12, 32, %s2774_s30, %s2759_s18  }
 0x56e PF: > { %s2785_s15 = sand.u32 1, %s3409_s21   ;;  %p3277_p10 = pnand %p2906_p9, %p3514_p12 }
 0x56f   : > { %s2786_s16 = scalar_lea.sflag [#allocation5], %s2785_s15 }
 0x570   : > { %p3278_p0 = pneg %p3277_p10 }
 0x572   : > { %3404 = dma.done.wait (%p3278_p0), %s2786_s16, 32  }
 0x573   : > { %3406 = vsyncadd (%p3278_p0), %s2786_s16, 4294967264  ;;  %s5004_s17 = sld [smem:[#allocation9_spill]]  ;;  %p19_p1 = scmp.ge.s32.totalorder %s3489_s27, 4  }
 0x574   : > { %s5005_s21 = smov %s3413_s22  ;;  %s5006_s22 = smov %s3417_s23 }
 0x575   : > { %s5008_s24 = smov %s3489_s27  ;;  %21 = sbr.rel (!%p19_p1) target bundleno = 5 (0x5), region = 106 }
 0x579   : > { %s5007_s23 = smov %s5004_s17 }
 0x57a   :  { %2792 = vsyncpa [#allocation4], 1 }
 0x57b   :  { %2794 = vsyncpa [#allocation4 + $0x1], 1 }
 0x57c   :  { %2795 = vsyncpa [#allocation5], 1 }
 0x57d   :  { %2797 = vsyncpa [#allocation5 + $0x1], 1 }

</bundles_post_ra>
